<compile_context>
chip_gen: v7x
topology: tpu7x:2x2x1
jax: 0.10.0
libtpu: 0.0.40
codegen_flags: <defaults>
</compile_context>

<pallas_src>
import functools

import jax
import jax.numpy as jnp
import numpy as np
from jax.experimental import pallas as pl
from jax.experimental.pallas import tpu as pltpu

MLP_DIMS = [3, 64, 128, 128, 1024]   # default --pointnet_mlp_dims
FC_DIMS = [1024, 512, 512, 512]      # default --pointnet_fc_dims
MLP_DO_LAST_RELU = False             # default --pointnet_mlp_dolastrelu
C_PAD = 8                            # pad point coords 3 -> 8 (zeros) for clean tiling

# Legal on every generation (v7x has 64 MiB/TC); actual usage at default tiles is
# only a few MiB, this just gives the compiler headroom.
VMEM_LIMIT_BYTES = 48 * 1024 * 1024


def _round_up(a, m):
    return ((a + m - 1) // m) * m


# --------------------------------------------------------------------------
# Kernel 1: pointwise MLP + global max over the points axis.
# grid = (B_pad // tb  [parallel],  N_pad // tn  [arbitrary])
# Output block index is constant along the N axis -> it stays resident in VMEM
# and acts as the running-max accumulator.
# --------------------------------------------------------------------------
def _encoder_kernel(n_mlp, tb, tn, x_ref, *refs):
    out_ref = refs[-1]                  # (tb, 1024) f32, resident across the N axis
    param_refs = refs[:-1]              # w1,b1, ..., wL,bL
    ws = param_refs[0::2]
    bs = param_refs[1::2]

    ni = pl.program_id(1)

    # Pointwise MLP on this tile; M = tb*tn rows per MXU pass.
    h = x_ref[...].reshape(tb * tn, C_PAD)          # bf16 input tile
    for li in range(n_mlp):
        h = jnp.dot(h.astype(jnp.bfloat16), ws[li][...],
                    preferred_element_type=jnp.float32) + bs[li][...]
        if li < n_mlp - 1 or MLP_DO_LAST_RELU:
            h = jnp.maximum(h, 0.0)

    # Max over the points in this tile, then fold into the running max.
    tile_max = jnp.max(h.reshape(tb, tn, -1), axis=1)   # (tb, 1024)

    @pl.when(ni == 0)
    def _init():
        out_ref[...] = tile_max

    @pl.when(ni > 0)
    def _accum():
        out_ref[...] = jnp.maximum(out_ref[...], tile_max)


# --------------------------------------------------------------------------
# Kernel 2: the FC head, batched over a tile of batch rows (one dense GEMM
# per layer instead of per-element M=1 matmuls).
# --------------------------------------------------------------------------
def _fc_kernel(n_fc, g_ref, *refs):
    out_ref = refs[-1]
    param_refs = refs[:-1]
    ws = param_refs[0::2]
    bs = param_refs[1::2]

    f = g_ref[...]                                   # (tm, 1024) f32
    for li in range(n_fc):
        f = jnp.dot(f.astype(jnp.bfloat16), ws[li][...],
                    preferred_element_type=jnp.float32) + bs[li][...]
        if li < n_fc - 1:
            f = jnp.maximum(f, 0.0)
    out_ref[...] = f


def pointnet_vanilla_pallas(x, params, *, tn=None, tb=None):
    """x: (B, N, 3) float32.  params: list of (W(din,dout), b(1,dout)) f32.
    Returns (B, FC_DIMS[-1]) float32."""
    B, N, C = x.shape
    assert C == MLP_DIMS[0]
    assert MLP_DIMS[-1] == FC_DIMS[0]
    n_mlp = len(MLP_DIMS) - 1
    n_fc = len(FC_DIMS) - 1
    d_feat = MLP_DIMS[-1]
    d_out = FC_DIMS[-1]

    # ---- tile choice: target M = tb*tn >= 256 rows per MXU pass ----
    if tn is None:
        tn = min(_round_up(N, 8), 512)
    if tb is None:
        tb = max(1, min(B, pl.cdiv(256, tn)))

    N_pad = _round_up(N, tn)
    B_pad = _round_up(B, tb)

    # Pad N / B by REPLICATING real points / clouds: the max-pool result is
    # unchanged by duplicated points, and padded batch rows are sliced off.
    if N_pad != N:
        x = jnp.concatenate(
            [x, jnp.broadcast_to(x[:, :1, :], (B, N_pad - N, C))], axis=1)
    if B_pad != B:
        x = jnp.concatenate(
            [x, jnp.broadcast_to(x[:1], (B_pad - B, N_pad, C))], axis=0)

    # Pad coords 3 -> C_PAD with zeros (exact: W1's extra rows are zero too),
    # and cast the point cloud to bf16 for the MXU / to halve the DMA.
    x_pad = jnp.zeros((B_pad, N_pad, C_PAD), jnp.bfloat16)
    x_pad = x_pad.at[:, :, :C].set(x.astype(jnp.bfloat16))

    mlp_params, fc_params = params[:n_mlp], params[n_mlp:]

    # ----- encoder (pointwise MLP + global max) -----
    w1, b1 = mlp_params[0]
    w1_pad = jnp.zeros((C_PAD, w1.shape[1]), jnp.float32).at[:C, :].set(w1)
    mlp_flat = [w1_pad.astype(jnp.bfloat16), b1]
    for (w, b) in mlp_params[1:]:
        mlp_flat += [w.astype(jnp.bfloat16), b]      # weights bf16, biases f32

    enc_in_specs = [pl.BlockSpec((tb, tn, C_PAD), lambda bi, ni: (bi, ni, 0))]
    for p in mlp_flat:
        # NOTE: bind ndim via default arg to avoid late-binding on `p`.
        enc_in_specs.append(
            pl.BlockSpec(p.shape, lambda bi, ni, nd=p.ndim: (0,) * nd))

    pooled = pl.pallas_call(
        functools.partial(_encoder_kernel, n_mlp, tb, tn),
        out_shape=jax.ShapeDtypeStruct((B_pad, d_feat), jnp.float32),
        grid_spec=pltpu.PrefetchScalarGridSpec(
            num_scalar_prefetch=0,
            grid=(B_pad // tb, N_pad // tn),
            in_specs=enc_in_specs,
            out_specs=pl.BlockSpec((tb, d_feat), lambda bi, ni: (bi, 0)),
        ),
        compiler_params=pltpu.CompilerParams(
            dimension_semantics=("parallel", "arbitrary"),
            vmem_limit_bytes=VMEM_LIMIT_BYTES,
        ),
    )(x_pad, *mlp_flat)

    # ----- FC head, batched over B (hoisted out of the per-point kernel) -----
    g = pooled[:B]
    tm = min(_round_up(B, 8), 256)
    B_fc = _round_up(B, tm)
    if B_fc != B:
        g = jnp.concatenate([g, jnp.zeros((B_fc - B, d_feat), jnp.float32)], axis=0)

    fc_flat = []
    for (w, b) in fc_params:
        fc_flat += [w.astype(jnp.bfloat16), b]

    fc_in_specs = [pl.BlockSpec((tm, d_feat), lambda i: (i, 0))]
    for p in fc_flat:
        fc_in_specs.append(pl.BlockSpec(p.shape, lambda i, nd=p.ndim: (0,) * nd))

    out = pl.pallas_call(
        functools.partial(_fc_kernel, n_fc),
        out_shape=jax.ShapeDtypeStruct((B_fc, d_out), jnp.float32),
        grid_spec=pltpu.PrefetchScalarGridSpec(
            num_scalar_prefetch=0,
            grid=(B_fc // tm,),
            in_specs=fc_in_specs,
            out_specs=pl.BlockSpec((tm, d_out), lambda i: (i, 0)),
        ),
        compiler_params=pltpu.CompilerParams(
            dimension_semantics=("parallel",),
            vmem_limit_bytes=VMEM_LIMIT_BYTES,
        ),
    )(g, *fc_flat)

    return out[:B]


def init_params(key):
    """Deterministic xavier_uniform(gain=sqrt(2)) weights, zero biases (matches torch init)."""
    params = []
    for dims in [MLP_DIMS, FC_DIMS]:
        for i in range(1, len(dims)):
            din, dout = dims[i - 1], dims[i]
            key, sub = jax.random.split(key)
            gain = float(np.sqrt(2.0))  # nn.init.calculate_gain('relu')
            bound = gain * float(np.sqrt(6.0 / (din + dout)))
            w = jax.random.uniform(sub, (din, dout), jnp.float32, -bound, bound)
            b = jnp.zeros((1, dout), jnp.float32)
            params.append((w, b))
    return params


def reference_f32(x, params):
    """Pure-JAX f32 reference of the PyTorch forward pass."""
    n_mlp = len(MLP_DIMS) - 1
    h = x
    for i, (w, b) in enumerate(params[:n_mlp]):
        h = h @ w + b
        if i < n_mlp - 1 or MLP_DO_LAST_RELU:
            h = jnp.maximum(h, 0.0)
    g = jnp.max(h, axis=1)                           # == AdaptiveMaxPool2d((1, K))
    f = g
    fcs = params[n_mlp:]
    for i, (w, b) in enumerate(fcs):
        f = f @ w + b
        if i < len(fcs) - 1:
            f = jnp.maximum(f, 0.0)
    return f


def reference_bf16(x, params):
    """Same numerics as the kernels: bf16 dot inputs, f32 accumulation/bias/ReLU."""
    def dot_bf16(a, w):
        return jnp.dot(a.astype(jnp.bfloat16), w.astype(jnp.bfloat16),
                       preferred_element_type=jnp.float32)
    n_mlp = len(MLP_DIMS) - 1
    h = x
    for i, (w, b) in enumerate(params[:n_mlp]):
        h = dot_bf16(h, w) + b
        if i < n_mlp - 1 or MLP_DO_LAST_RELU:
            h = jnp.maximum(h, 0.0)
    g = jnp.max(h, axis=1)
    f = g
    fcs = params[n_mlp:]
    for i, (w, b) in enumerate(fcs):
        f = dot_bf16(f, w) + b
        if i < len(fcs) - 1:
            f = jnp.maximum(f, 0.0)
    return f


if __name__ == "__main__":
    key = jax.random.PRNGKey(0)
    key, kx = jax.random.split(key)

    B, N = 2, 64                                     # small demo: 2 clouds of 64 points x 3 coords
    x = jax.random.normal(kx, (B, N, MLP_DIMS[0]), jnp.float32)
    params = init_params(key)

    out = jax.block_until_ready(pointnet_vanilla_pallas(x, params))
    assert out.shape == (B, FC_DIMS[-1]), out.shape

    # Tight check against a reference with identical bf16-input / f32-accum math.
    ref_match = reference_bf16(x, params)
    np.testing.assert_allclose(np.asarray(out), np.asarray(ref_match), rtol=2e-3, atol=2e-3)

    # Loose check against the full-f32 PyTorch-equivalent forward (bf16 precision).
    ref_full = reference_f32(x, params)
    np.testing.assert_allclose(np.asarray(out), np.asarray(ref_full), rtol=5e-2, atol=5e-2)

    print("KERNEL_OK")
</pallas_src>

<mosaic_0001>
module attributes {stable_mosaic.version = 11 : i64} {
  func.func @_encoder_kernel(%arg0: i32, %arg1: i32, %arg2: memref<2x64x8xbf16, #tpu.memory_space<vmem>>, %arg3: memref<8x64xbf16, #tpu.memory_space<vmem>>, %arg4: memref<1x64xf32, #tpu.memory_space<vmem>>, %arg5: memref<64x128xbf16, #tpu.memory_space<vmem>>, %arg6: memref<1x128xf32, #tpu.memory_space<vmem>>, %arg7: memref<128x128xbf16, #tpu.memory_space<vmem>>, %arg8: memref<1x128xf32, #tpu.memory_space<vmem>>, %arg9: memref<128x1024xbf16, #tpu.memory_space<vmem>>, %arg10: memref<1x1024xf32, #tpu.memory_space<vmem>>, %arg11: memref<2x1024xf32, #tpu.memory_space<vmem>>) attributes {dimension_semantics = [#tpu.dimension_semantics<parallel>, #tpu.dimension_semantics<arbitrary>], iteration_bounds = array<i64: 1, 1>, scalar_prefetch = 0 : i64, scratch_operands = 0 : i64, tpu.core_type = #tpu.core_type<tc>, window_params = [{transform_indices = @transform_0, window_bounds = array<i64: 2, 64, 8>}, {pipeline_mode = #tpu.pipeline_mode<synchronous>, transform_indices = @transform_1, window_bounds = array<i64: 8, 64>}, {pipeline_mode = #tpu.pipeline_mode<synchronous>, transform_indices = @transform_2, window_bounds = array<i64: 1, 64>}, {pipeline_mode = #tpu.pipeline_mode<synchronous>, transform_indices = @transform_3, window_bounds = array<i64: 64, 128>}, {pipeline_mode = #tpu.pipeline_mode<synchronous>, transform_indices = @transform_4, window_bounds = array<i64: 1, 128>}, {pipeline_mode = #tpu.pipeline_mode<synchronous>, transform_indices = @transform_5, window_bounds = array<i64: 128, 128>}, {pipeline_mode = #tpu.pipeline_mode<synchronous>, transform_indices = @transform_6, window_bounds = array<i64: 1, 128>}, {pipeline_mode = #tpu.pipeline_mode<synchronous>, transform_indices = @transform_7, window_bounds = array<i64: 128, 1024>}, {pipeline_mode = #tpu.pipeline_mode<synchronous>, transform_indices = @transform_8, window_bounds = array<i64: 1, 1024>}, {transform_indices = @transform_9, window_bounds = array<i64: 2, 1024>}]} {
    %c0 = arith.constant 0 : index
    %c0_0 = arith.constant 0 : index
    %c0_1 = arith.constant 0 : index
    %0 = vector.load %arg2[%c0, %c0_0, %c0_1] : memref<2x64x8xbf16, #tpu.memory_space<vmem>>, vector<2x64x8xbf16>
    %1 = vector.shape_cast %0 : vector<2x64x8xbf16> to vector<128x8xbf16>
    %c0_2 = arith.constant 0 : index
    %c0_3 = arith.constant 0 : index
    %2 = vector.load %arg3[%c0_2, %c0_3] : memref<8x64xbf16, #tpu.memory_space<vmem>>, vector<8x64xbf16>
    %cst = arith.constant dense<0.000000e+00> : vector<128x64xf32>
    %3 = tpu.matmul %1, %2, %cst {dimension_numbers = #tpu.dot_dimension_numbers<[1], [0], [0], [1], [0, 0, 1, 1], [], []>} : vector<128x8xbf16>, vector<8x64xbf16>, vector<128x64xf32> -> vector<128x64xf32>
    %c0_4 = arith.constant 0 : index
    %c0_5 = arith.constant 0 : index
    %4 = vector.load %arg4[%c0_4, %c0_5] : memref<1x64xf32, #tpu.memory_space<vmem>>, vector<1x64xf32>
    %5 = vector.broadcast %4 : vector<1x64xf32> to vector<128x64xf32>
    %6 = arith.addf %3, %5 : vector<128x64xf32>
    %cst_6 = arith.constant 0.000000e+00 : f32
    %7 = vector.broadcast %cst_6 : f32 to vector<128x64xf32>
    %8 = arith.maximumf %6, %7 : vector<128x64xf32>
    %9 = arith.truncf %8 : vector<128x64xf32> to vector<128x64xbf16>
    %c0_7 = arith.constant 0 : index
    %c0_8 = arith.constant 0 : index
    %10 = vector.load %arg5[%c0_7, %c0_8] : memref<64x128xbf16, #tpu.memory_space<vmem>>, vector<64x128xbf16>
    %cst_9 = arith.constant dense<0.000000e+00> : vector<128x128xf32>
    %11 = tpu.matmul %9, %10, %cst_9 {dimension_numbers = #tpu.dot_dimension_numbers<[1], [0], [0], [1], [0, 0, 1, 1], [], []>} : vector<128x64xbf16>, vector<64x128xbf16>, vector<128x128xf32> -> vector<128x128xf32>
    %c0_10 = arith.constant 0 : index
    %c0_11 = arith.constant 0 : index
    %12 = vector.load %arg6[%c0_10, %c0_11] : memref<1x128xf32, #tpu.memory_space<vmem>>, vector<1x128xf32>
    %13 = vector.broadcast %12 : vector<1x128xf32> to vector<128x128xf32>
    %14 = arith.addf %11, %13 : vector<128x128xf32>
    %cst_12 = arith.constant 0.000000e+00 : f32
    %15 = vector.broadcast %cst_12 : f32 to vector<128x128xf32>
    %16 = arith.maximumf %14, %15 : vector<128x128xf32>
    %17 = arith.truncf %16 : vector<128x128xf32> to vector<128x128xbf16>
    %c0_13 = arith.constant 0 : index
    %c0_14 = arith.constant 0 : index
    %18 = vector.load %arg7[%c0_13, %c0_14] : memref<128x128xbf16, #tpu.memory_space<vmem>>, vector<128x128xbf16>
    %cst_15 = arith.constant dense<0.000000e+00> : vector<128x128xf32>
    %19 = tpu.matmul %17, %18, %cst_15 {dimension_numbers = #tpu.dot_dimension_numbers<[1], [0], [0], [1], [0, 0, 1, 1], [], []>} : vector<128x128xbf16>, vector<128x128xbf16>, vector<128x128xf32> -> vector<128x128xf32>
    %c0_16 = arith.constant 0 : index
    %c0_17 = arith.constant 0 : index
    %20 = vector.load %arg8[%c0_16, %c0_17] : memref<1x128xf32, #tpu.memory_space<vmem>>, vector<1x128xf32>
    %21 = vector.broadcast %20 : vector<1x128xf32> to vector<128x128xf32>
    %22 = arith.addf %19, %21 : vector<128x128xf32>
    %cst_18 = arith.constant 0.000000e+00 : f32
    %23 = vector.broadcast %cst_18 : f32 to vector<128x128xf32>
    %24 = arith.maximumf %22, %23 : vector<128x128xf32>
    %25 = arith.truncf %24 : vector<128x128xf32> to vector<128x128xbf16>
    %c0_19 = arith.constant 0 : index
    %c0_20 = arith.constant 0 : index
    %26 = vector.load %arg9[%c0_19, %c0_20] : memref<128x1024xbf16, #tpu.memory_space<vmem>>, vector<128x1024xbf16>
    %cst_21 = arith.constant dense<0.000000e+00> : vector<128x1024xf32>
    %27 = tpu.matmul %25, %26, %cst_21 {dimension_numbers = #tpu.dot_dimension_numbers<[1], [0], [0], [1], [0, 0, 1, 1], [], []>} : vector<128x128xbf16>, vector<128x1024xbf16>, vector<128x1024xf32> -> vector<128x1024xf32>
    %c0_22 = arith.constant 0 : index
    %c0_23 = arith.constant 0 : index
    %28 = vector.load %arg10[%c0_22, %c0_23] : memref<1x1024xf32, #tpu.memory_space<vmem>>, vector<1x1024xf32>
    %29 = vector.broadcast %28 : vector<1x1024xf32> to vector<128x1024xf32>
    %30 = arith.addf %27, %29 : vector<128x1024xf32>
    %31 = vector.shape_cast %30 : vector<128x1024xf32> to vector<2x64x1024xf32>
    %cst_24 = arith.constant dense<0xFF800000> : vector<2x1024xf32>
    %32 = vector.multi_reduction <maximumf>, %31, %cst_24 [1] : vector<2x64x1024xf32> to vector<2x1024xf32>
    %c0_i32 = arith.constant 0 : i32
    %33 = arith.cmpi eq, %arg1, %c0_i32 : i32
    %34 = arith.extui %33 : i1 to i32
    %c0_i32_25 = arith.constant 0 : i32
    %35 = arith.cmpi ne, %34, %c0_i32_25 : i32
    scf.if %35 {
      %c0_28 = arith.constant 0 : index
      %c0_29 = arith.constant 0 : index
      %39 = vector.load %arg11[%c0_28, %c0_29] : memref<2x1024xf32, #tpu.memory_space<vmem>>, vector<2x1024xf32>
      tpu.vector_store %arg11[%c0_28, %c0_29], %32 {strides = array<i32>} : memref<2x1024xf32, #tpu.memory_space<vmem>>, vector<2x1024xf32>,
    } else {
    }
    %c0_i32_26 = arith.constant 0 : i32
    %36 = arith.cmpi sgt, %arg1, %c0_i32_26 : i32
    %37 = arith.extui %36 : i1 to i32
    %c0_i32_27 = arith.constant 0 : i32
    %38 = arith.cmpi ne, %37, %c0_i32_27 : i32
    scf.if %38 {
      %c0_28 = arith.constant 0 : index
      %c0_29 = arith.constant 0 : index
      %39 = vector.load %arg11[%c0_28, %c0_29] : memref<2x1024xf32, #tpu.memory_space<vmem>>, vector<2x1024xf32>
      %40 = arith.maximumf %39, %32 : vector<2x1024xf32>
      %c0_30 = arith.constant 0 : index
      %c0_31 = arith.constant 0 : index
      %41 = vector.load %arg11[%c0_30, %c0_31] : memref<2x1024xf32, #tpu.memory_space<vmem>>, vector<2x1024xf32>
      tpu.vector_store %arg11[%c0_30, %c0_31], %40 {strides = array<i32>} : memref<2x1024xf32, #tpu.memory_space<vmem>>, vector<2x1024xf32>,
    } else {
    }
    return
  }
  func.func @transform_0(%arg0: i32, %arg1: i32) -> (i32, i32, i32) {
    %c0_i32 = arith.constant 0 : i32
    %c0_i32_0 = arith.constant 0 : i32
    return %arg0, %arg1, %c0_i32 : i32, i32, i32
  }
  func.func @transform_1(%arg0: i32, %arg1: i32) -> (i32, i32) {
    %c0_i32 = arith.constant 0 : i32
    %c0_i32_0 = arith.constant 0 : i32
    %c0_i32_1 = arith.constant 0 : i32
    return %c0_i32, %c0_i32_0 : i32, i32
  }
  func.func @transform_2(%arg0: i32, %arg1: i32) -> (i32, i32) {
    %c0_i32 = arith.constant 0 : i32
    %c0_i32_0 = arith.constant 0 : i32
    %c0_i32_1 = arith.constant 0 : i32
    return %c0_i32, %c0_i32_0 : i32, i32
  }
  func.func @transform_3(%arg0: i32, %arg1: i32) -> (i32, i32) {
    %c0_i32 = arith.constant 0 : i32
    %c0_i32_0 = arith.constant 0 : i32
    %c0_i32_1 = arith.constant 0 : i32
    return %c0_i32, %c0_i32_0 : i32, i32
  }
  func.func @transform_4(%arg0: i32, %arg1: i32) -> (i32, i32) {
    %c0_i32 = arith.constant 0 : i32
    %c0_i32_0 = arith.constant 0 : i32
    %c0_i32_1 = arith.constant 0 : i32
    return %c0_i32, %c0_i32_0 : i32, i32
  }
  func.func @transform_5(%arg0: i32, %arg1: i32) -> (i32, i32) {
    %c0_i32 = arith.constant 0 : i32
    %c0_i32_0 = arith.constant 0 : i32
    %c0_i32_1 = arith.constant 0 : i32
    return %c0_i32, %c0_i32_0 : i32, i32
  }
  func.func @transform_6(%arg0: i32, %arg1: i32) -> (i32, i32) {
    %c0_i32 = arith.constant 0 : i32
    %c0_i32_0 = arith.constant 0 : i32
    %c0_i32_1 = arith.constant 0 : i32
    return %c0_i32, %c0_i32_0 : i32, i32
  }
  func.func @transform_7(%arg0: i32, %arg1: i32) -> (i32, i32) {
    %c0_i32 = arith.constant 0 : i32
    %c0_i32_0 = arith.constant 0 : i32
    %c0_i32_1 = arith.constant 0 : i32
    return %c0_i32, %c0_i32_0 : i32, i32
  }
  func.func @transform_8(%arg0: i32, %arg1: i32) -> (i32, i32) {
    %c0_i32 = arith.constant 0 : i32
    %c0_i32_0 = arith.constant 0 : i32
    %c0_i32_1 = arith.constant 0 : i32
    return %c0_i32, %c0_i32_0 : i32, i32
  }
  func.func @transform_9(%arg0: i32, %arg1: i32) -> (i32, i32) {
    %c0_i32 = arith.constant 0 : i32
    %c0_i32_0 = arith.constant 0 : i32
    return %arg0, %c0_i32 : i32, i32
  }
}

</mosaic_0001>

<bundles_post_ra>
// kernel: tpu_custom_call.1
= control target key start
LH: loop header
LB: loop body
LE: loop exit
PB: predicated region body
PF: predicated region fallthrough
CT: control target
= control target key end

     0   :  { %14 = vsyncpa [#allocation3], 0  ;;  %s2865_s0 = inlined_call_operand.vmem [shape: bf16[2,64,8], index: 0, kind: input, shape index: {}]   ;;  %s2866_s1 = inlined_call_operand.vmem [shape: bf16[8,64], index: 1, kind: input, shape index: {}]   ;;  %s2867_s2 = inlined_call_operand.vmem [shape: f32[1,64], index: 2, kind: input, shape index: {}]   ;;  %s2868_s3 = inlined_call_operand.hbm [shape: bf16[64,128], index: 3, kind: input, shape index: {}]   ;;  %s2869_s4 = inlined_call_operand.vmem [shape: f32[1,128], index: 4, kind: input, shape index: {}]   ;;  %s2870_s5 = inlined_call_operand.vmem [shape: bf16[128,128], index: 5, kind: input, shape index: {}]   ;;  %s2871_s6 = inlined_call_operand.vmem [shape: f32[1,128], index: 6, kind: input, shape index: {}]   ;;  %s2872_s7 = inlined_call_operand.hbm [shape: bf16[128,1024], index: 7, kind: input, shape index: {}]   ;;  %s2873_s8 = inlined_call_operand.vmem [shape: f32[1,1024], index: 8, kind: input, shape index: {}]   ;;  %s2874_s9 = inlined_call_operand.hbm [shape: f32[2,1024], index: 9, kind: output, shape index: {}]  }
   0x1   :  { %15 = vsyncpa [#allocation6], 0 }
   0x2   :  { %16 = vsyncpa [#allocation4], 0  ;;  %s2315_s30 = smov [#allocation2]   ;;  %s2243_s13 = scalar_lea.hbm %s2868_s3, 512 }
   0x3   :  { %s28_s10 = sshll.u32 %s2315_s30, 4  ;;  %p2244_p0 = scmp.ne.s32.totalorder %s2868_s3, %s2243_s13  ;;  %s29_s10 = int_to_ptr.vmem [resolvable:$true] %s28_s10 }
   0x4   :  { %p2247_p1 = scmp.lt.u32.totalorder %s2243_s13, %s2868_s3 }
   0x6   :  { %p2249_p2 = pnand %p2247_p1, %p2244_p0 }
   0x8   :  { %2252 = shalt.err (!%p2249_p2)
}
   0x9   :  { %s2253_s18 = scalar_lea.vmem %s29_s10, 512  ;;  %p2258_p4 = scmp.lt.s32.totalorder %s29_s10, %s29_s10 }
   0xa   :  { %p2254_p3 = scmp.ne.s32.totalorder %s29_s10, %s2253_s18  ;;  %p2259_p5 = scmp.lt.s32.totalorder %s2253_s18, %s2253_s18 }
   0xc   :  { %p2260_p6 = por %p2259_p5, %p2258_p4 }
   0xe   :  { %p2261_p7 = pnand %p2260_p6, %p2254_p3 }
  0x10   :  { %2264 = shalt.err (!%p2261_p7)
}
  0x11   :  { %s2316_s19 = smov 64   ;;  %s2317_s20 = smov 4  }
  0x12   :  { %34 = dma.hbm_to_vmem [thread:$0]  %s2868_s3, 512, %s29_s10, [#allocation3], %s2316_s19, %s2316_s19, %s2317_s20  }
  0x13   :  { %s2318_s23 = smov [#allocation5]   ;;  %s2265_s27 = scalar_lea.hbm %s2872_s7, 8192 }
  0x14   :  { %s46_s24 = sshll.u32 %s2318_s23, 4  ;;  %p2266_p8 = scmp.ne.s32.totalorder %s2872_s7, %s2265_s27  ;;  %s47_s24 = int_to_ptr.vmem [resolvable:$true] %s46_s24 }
  0x15   :  { %p2269_p9 = scmp.lt.u32.totalorder %s2265_s27, %s2872_s7 }
  0x17   :  { %p2271_p10 = pnand %p2269_p9, %p2266_p8 }
  0x19   :  { %2274 = shalt.err (!%p2271_p10)
}
  0x1a   :  { %s2275_s12 = scalar_lea.vmem %s47_s24, 8192  ;;  %p2280_p12 = scmp.lt.s32.totalorder %s47_s24, %s47_s24 }
  0x1b   :  { %p2276_p11 = scmp.ne.s32.totalorder %s47_s24, %s2275_s12  ;;  %p2281_p13 = scmp.lt.s32.totalorder %s2275_s12, %s2275_s12 }
  0x1d   :  { %p2282_p0 = por %p2281_p13, %p2280_p12 }
  0x1f   :  { %p2283_p1 = pnand %p2282_p0, %p2276_p11 }
  0x21   :  { %2286 = shalt.err (!%p2283_p1)
}
  0x22   :  { %s2319_s3 = smov 512   ;;  %s2320_s10 = smov 32  }
  0x23   :  { %52 = dma.hbm_to_vmem [thread:$0]  %s2872_s7, 8192, %s47_s24, [#allocation6], %s2319_s3, %s2319_s3, %s2320_s10  }
  0x24   :  { %2309 = dma.done.wait [#allocation3], 512  }
  0x25   :  { %2310 = vsyncadd [#allocation3], 4294966784 }
  0x26   :  { %2311 = dma.done.wait [#allocation6], 8192  }
  0x27   :  { %2312 = vsyncadd [#allocation6], 4294959104  ;;  %vm151_vm0 = vcmask 1043456   ;;  %vm126_vm1 = vcmask 64512   ;;  %v78_v0 = vld [vmem:[%s2866_s1] sm:$0xf] }
  0x28   :  { %2213 = vmatprep.subr.msk.bf16.mxu0 %vm151_vm0, %v78_v0  ;;  %v153_v1 = vsel %vm151_vm0, %v78_v0, 0  ;;  %v2223_v2 = vld [vmem:[%s2865_s0] sm:$0xff]   ;;  %v2224_v3 = vld [vmem:[%s2865_s0 + $0x8] sm:$0xff]   ;;  %v2225_v4 = vld [vmem:[%s2865_s0 + $0x10] sm:$0xff]   ;;  %vm315_vm2 = vcmask 523264   ;;  %vm1832_vm3 = vcmask 1041409  }
  0x29   :  { %2124 = vmatpush3.bf16.msra.mxu0 %v153_v1  ;;  %2125 = vmatprep.mubr.msk.bf16.mxu0 %vm126_vm1, %v2223_v2  ;;  %v2226_v5 = vld [vmem:[%s2865_s0 + $0x18] sm:$0xff]   ;;  %v2227_v6 = vld [vmem:[%s2865_s0 + $0x20] sm:$0xff]   ;;  %v2231_v7 = vld [vmem:[#allocation2] sm:$0xff]   ;;  %vm1834_vm4 = vcmask 1043459   ;;  %vm1836_vm5 = vcmask 1045509   ;;  %vm1838_vm6 = vcmask 1047559  }
  0x2a   :  { %v2232_v8 = vld [vmem:[#allocation2 + $0x8] sm:$0xff]   ;;  %2141 = vmatprep.subr.bf16.mxu1 %v2231_v7  ;;  %v2228_v9 = vld [vmem:[%s2865_s0 + $0x28] sm:$0xff]   ;;  %v2230_v11 = vld [vmem:[%s2865_s0 + $0x38] sm:$0xff]  }
  0x2b   :  { %2142 = vmatpush3.bf16.msra.mxu1 %v2231_v7  ;;  %v2229_v10 = vld [vmem:[%s2865_s0 + $0x30] sm:$0xff]   ;;  %v2233_v12 = vld [vmem:[#allocation2 + $0x10] sm:$0xff]   ;;  %v2234_v13 = vld [vmem:[#allocation2 + $0x18] sm:$0xff]  }
  0x2c   :  { %2126 = vmatmul.mubr.msk.bf16.vlgmr.msra.gmra.mrb[0].mxu0 %vm126_vm1, %v2224_v3  ;;  %2143 = vmatprep.subr.bf16.mxu1 %v2232_v8  ;;  %v2235_v14 = vld [vmem:[%s2870_s5] sm:$0xff]   ;;  %v2236_v15 = vld [vmem:[%s2870_s5 + $0x8] sm:$0xff]   ;;  %v2237_v16 = vld [vmem:[%s2870_s5 + $0x10] sm:$0xff]  }
  0x2d   :  { %2129 = vmatprep.mubr.msk.bf16.mxu0 %vm126_vm1, %v2225_v4  ;;  %2165 = vmatprep.subr.bf16.mxu0 %v2235_v14  ;;  %v2238_v17 = vld [vmem:[%s2870_s5 + $0x18] sm:$0xff]   ;;  %v2239_v18 = vld [vmem:[%s2870_s5 + $0x20] sm:$0xff]   ;;  %v2240_v19 = vld [vmem:[%s2870_s5 + $0x28] sm:$0xff]  }
  0x2e   :  { %2166 = vmatpush3.bf16.msra.mxu0 %v2235_v14  ;;  %v1983_v20 = vld [vmem:[%s2867_s2] ss:$0 sm:$0xff]  ;;  %v2242_v14 = vld [vmem:[%s2870_s5 + $0x38] sm:$0xff]  }
  0x2f   :  { %2144 = vmatpush3.bf16.msra.mxu1 %v2232_v8  ;;  %2167 = vmatprep.subr.bf16.mxu0 %v2236_v15 }
  0x30   :  { %2145 = vmatprep.subr.bf16.mxu1 %v2233_v12 }
  0x32   :  { %2168 = vmatpush3.bf16.msra.mxu0 %v2236_v15  ;;  %v653_v15 = vld [vmem:[#allocation5] sm:$0xff] }
  0x33   :  { %2146 = vmatpush3.bf16.msra.mxu1 %v2233_v12  ;;  %2169 = vmatprep.subr.bf16.mxu0 %v2237_v16 }
  0x34   :  { %2130 = vmatmul.mubr.msk.bf16.gmra.mrb[4].mxu0 %vm126_vm1, %v2226_v5  ;;  %2147 = vmatprep.subr.bf16.mxu1 %v2234_v13 }
  0x35   :  { %2133 = vmatprep.mubr.msk.bf16.mxu0 %vm126_vm1, %v2227_v6 }
  0x36   :  { %2170 = vmatpush3.bf16.msra.mxu0 %v2237_v16  ;;  %v657_v16 = vld [vmem:[#allocation5 + $0x20] sm:$0xff] }
  0x37   :  { %2148 = vmatpush3.bf16.msra.mxu1 %v2234_v13  ;;  %2171 = vmatprep.subr.bf16.mxu0 %v2238_v17  ;;  %v2241_v13 = vld [vmem:[%s2870_s5 + $0x30] sm:$0xff]  }
  0x3a   :  { %2172 = vmatpush3.bf16.msra.mxu0 %v2238_v17  ;;  %v2468_v17 = vld [vmem:[#allocation5 + $0x8] sm:$0xff] }
  0x3b   :  { %2173 = vmatprep.subr.bf16.mxu0 %v2239_v18 }
  0x3c   :  { %2134 = vmatmul.mubr.msk.bf16.gmra.mrb[8].mxu0 %vm126_vm1, %v2228_v9 }
  0x3d   :  { %2137 = vmatprep.mubr.msk.bf16.mxu0 %vm126_vm1, %v2229_v10 }
  0x3e   :  { %2174 = vmatpush3.bf16.msra.mxu0 %v2239_v18  ;;  %v2022_v18 = vcombine.low %v653_v15, %v657_v16 }
  0x3f   :  { %2175 = vmatprep.subr.bf16.mxu0 %v2240_v19 }
  0x42   :  { %2176 = vmatpush3.bf16.msra.mxu0 %v2240_v19  ;;  %v2023_v19 = vcombine.high %v653_v15, %v657_v16 }
  0x43   :  { %2177 = vmatprep.subr.bf16.mxu0 %v2241_v13 }
  0x44   :  { %2138 = vmatmul.mubr.msk.bf16.gmra.mrb[12].mxu0 %vm126_vm1, %v2230_v11  ;;  %1079 = vmatprep.subr.bf16.mxu1 %v2023_v19 }
  0x46   :  { %2178 = vmatpush3.bf16.msra.mxu0 %v2241_v13  ;;  %v678_v13 = vld [vmem:[#allocation5 + $0xc8] sm:$0xff] }
  0x47   :  { %2179 = vmatprep.subr.bf16.mxu0 %v2242_v14 }
  0x4a   :  { %2180 = vmatpush3.bf16.msra.mxu0 %v2242_v14  ;;  %v682_v14 = vld [vmem:[#allocation5 + $0xe8] sm:$0xff] }
  0xff   :  { %v2127_v21 = vpop.f32.mrb[0].mxu0 }
 0x100   :  { %v198_v22 = vadd.f32 %v2127_v21, %v1983_v20  ;;  %v189_v23 = vpop.f32.mrb[1].mxu0  ;;  %v661_v21 = vld [vmem:[#allocation5 + $0x40] sm:$0xff] }
 0x101   :  { %v190_v24 = vadd.f32 %v1983_v20, %v189_v23  ;;  %v2128_v25 = vpop.f32.mrb[2].mxu0 }
 0x102   :  { %v201_v26 = vadd.f32 %v2128_v25, %v1983_v20  ;;  %v192_v27 = vpop.f32.mrb[3].mxu0  ;;  %v254_v29 = vmax.f32 %v198_v22, 0.0  ;;  %v665_v22 = vld [vmem:[#allocation5 + $0x60] sm:$0xff] }
 0x103   :  { %v193_v28 = vadd.f32 %v1983_v20, %v192_v27  ;;  %v252_v31 = vmax.f32 %v190_v24, 0.0  ;;  %v2031_v25 = vcombine.high %v661_v21, %v665_v22  ;;  %v673_v27 = vld [vmem:[#allocation5 + $0xa0] sm:$0xff] }
 0x104   :  { %v255_v30 = vmax.f32 %v201_v26, 0.0  ;;  %v669_v26 = vld [vmem:[#allocation5 + $0x80] sm:$0xff] }
 0x105   :  { %v253_v32 = vmax.f32 %v193_v28, 0.0  ;;  %v2030_v28 = vcombine.low %v661_v21, %v665_v22 }
 0x106   :  { %v269_v33 = vpack.c.bf16 %v255_v30, %v254_v29  ;;  %v2039_v29 = vcombine.high %v669_v26, %v673_v27  ;;  %v677_v30 = vld [vmem:[#allocation5 + $0xc0] sm:$0xff] }
 0x107   :  { %v2131_v34 = vpop.f32.mrb[4].mxu0  ;;  %v268_v35 = vpack.c.bf16 %v253_v32, %v252_v31  ;;  %v681_v31 = vld [vmem:[#allocation5 + $0xe0] sm:$0xff]  ;;  %v2038_v32 = vcombine.low %v669_v26, %v673_v27 }
 0x108   :  { %v214_v36 = vadd.f32 %v2131_v34, %v1983_v20  ;;  %v205_v37 = vpop.f32.mrb[5].mxu0  ;;  %v685_v34 = vld [vmem:[#allocation5 + $0x100] sm:$0xff] }
 0x109   :  { %v206_v38 = vadd.f32 %v1983_v20, %v205_v37  ;;  %v2132_v39 = vpop.f32.mrb[6].mxu0  ;;  %2149 = vmatprep.mubr.msk.bf16.mxu1 %vm315_vm2, %v268_v35  ;;  %v689_v35 = vld [vmem:[#allocation5 + $0x120] sm:$0xff] }
 0x10a   :  { %v258_v40 = vmax.f32 %v214_v36, 0.0  ;;  %v217_v41 = vadd.f32 %v2132_v39, %v1983_v20  ;;  %v208_v42 = vpop.f32.mrb[7].mxu0  ;;  %2150 = vmatmul.mubr.msk.bf16.vlgmr.msra.gmra.mrb[0].mxu1 %vm315_vm2, %v269_v33  ;;  %v2047_v33 = vcombine.high %v677_v30, %v681_v31  ;;  %v2046_v36 = vcombine.low %v677_v30, %v681_v31  ;;  %v697_v39 = vld [vmem:[#allocation5 + $0x160] sm:$0xff] }
 0x10b   :  { %v256_v43 = vmax.f32 %v206_v38, 0.0  ;;  %v209_v44 = vadd.f32 %v1983_v20, %v208_v42  ;;  %1080 = vmatpush1.bf16.msra.mxu1 %v2022_v18  ;;  %v2055_v37 = vcombine.high %v685_v34, %v689_v35  ;;  %v693_v38 = vld [vmem:[#allocation5 + $0x140] sm:$0xff]  ;;  %v2048_v31 = vcombine.low %v678_v13, %v682_v14 }
 0x10c   :  { %v259_v45 = vmax.f32 %v217_v41, 0.0  ;;  %1081 = vmatprep.subr.bf16.mxu1 %v2031_v25  ;;  %v2063_v41 = vcombine.high %v693_v38, %v697_v39  ;;  %v2062_v42 = vcombine.low %v693_v38, %v697_v39  ;;  %v690_v25 = vld [vmem:[#allocation5 + $0x128] sm:$0xff] }
 0x10d   :  { %v257_v46 = vmax.f32 %v209_v44, 0.0 }
 0x10e   :  { %v271_v47 = vpack.c.bf16 %v259_v45, %v258_v40  ;;  %v2054_v40 = vcombine.low %v685_v34, %v689_v35  ;;  %v694_v35 = vld [vmem:[#allocation5 + $0x148] sm:$0xff] }
 0x10f   :  { %v270_v48 = vpack.c.bf16 %v257_v46, %v256_v43  ;;  %v2135_v49 = vpop.f32.mrb[8].mxu0  ;;  %1082 = vmatpush1.bf16.msra.mxu1 %v2030_v28  ;;  %v2479_v43 = vld [vmem:[%s2869_s4] ss:$0 sm:$0xff] }
 0x110   :  { %v230_v50 = vadd.f32 %v2135_v49, %v1983_v20  ;;  %v221_v51 = vpop.f32.mrb[9].mxu0  ;;  %1083 = vmatprep.subr.bf16.mxu1 %v2039_v29 }
 0x111   :  { %2153 = vmatprep.mubr.msk.bf16.mxu1 %vm315_vm2, %v270_v48  ;;  %v222_v52 = vadd.f32 %v1983_v20, %v221_v51  ;;  %v2136_v53 = vpop.f32.mrb[10].mxu0 }
 0x112   :  { %2154 = vmatmul.mubr.msk.bf16.gmra.mrb[4].mxu1 %vm315_vm2, %v271_v47  ;;  %v262_v54 = vmax.f32 %v230_v50, 0.0  ;;  %v233_v55 = vadd.f32 %v2136_v53, %v1983_v20  ;;  %v224_v56 = vpop.f32.mrb[11].mxu0 }
 0x113   :  { %v260_v57 = vmax.f32 %v222_v52, 0.0  ;;  %v225_v58 = vadd.f32 %v1983_v20, %v224_v56  ;;  %1084 = vmatpush1.bf16.msra.mxu1 %v2038_v32  ;;  %v662_v56 = vld [vmem:[#allocation5 + $0x48] sm:$0xff] }
 0x114   :  { %v263_v59 = vmax.f32 %v233_v55, 0.0  ;;  %1085 = vmatprep.subr.bf16.mxu1 %v2047_v33 }
 0x115   :  { %v261_v60 = vmax.f32 %v225_v58, 0.0 }
 0x116   :  { %v273_v61 = vpack.c.bf16 %v263_v59, %v262_v54 }
 0x117   :  { %v272_v62 = vpack.c.bf16 %v261_v60, %v260_v57  ;;  %v2139_v63 = vpop.f32.mrb[12].mxu0  ;;  %1086 = vmatpush1.bf16.msra.mxu1 %v2046_v36  ;;  %v666_v57 = vld [vmem:[#allocation5 + $0x68] sm:$0xff] }
 0x118   :  { %v246_v0 = vadd.f32 %v2139_v63, %v1983_v20  ;;  %v237_v1 = vpop.f32.mrb[13].mxu0  ;;  %1087 = vmatprep.subr.bf16.mxu1 %v2055_v37  ;;  %v2033_v63 = vcombine.high %v662_v56, %v666_v57  ;;  %v698_v36 = vld [vmem:[#allocation5 + $0x168] sm:$0xff] }
 0x119   :  { %2157 = vmatprep.mubr.msk.bf16.mxu1 %vm315_vm2, %v272_v62  ;;  %v238_v2 = vadd.f32 %v1983_v20, %v237_v1  ;;  %v2140_v3 = vpop.f32.mrb[14].mxu0 }
 0x11a   :  { %2158 = vmatmul.mubr.msk.bf16.gmra.mrb[8].mxu1 %vm315_vm2, %v273_v61  ;;  %v266_v4 = vmax.f32 %v246_v0, 0.0  ;;  %v249_v5 = vadd.f32 %v2140_v3, %v1983_v20  ;;  %v240_v6 = vpop.f32.mrb[15].mxu0  ;;  %v674_v3 = vld [vmem:[#allocation5 + $0xa8] sm:$0xff] }
 0x11b   :  { %v264_v7 = vmax.f32 %v238_v2, 0.0  ;;  %v241_v8 = vadd.f32 %v1983_v20, %v240_v6  ;;  %v2470_v20 = vld [vmem:[#allocation5 + $0x28] sm:$0xff]  ;;  %1088 = vmatpush1.bf16.msra.mxu1 %v2054_v40 }
 0x11c   :  { %v267_v9 = vmax.f32 %v249_v5, 0.0  ;;  %v2024_v23 = vcombine.low %v2468_v17, %v2470_v20  ;;  %v2025_v24 = vcombine.high %v2468_v17, %v2470_v20  ;;  %1089 = vmatprep.subr.bf16.mxu1 %v2063_v41  ;;  %v670_v2 = vld [vmem:[#allocation5 + $0x88] sm:$0xff] }
 0x11d   :  { %v265_v10 = vmax.f32 %v241_v8, 0.0  ;;  %v2040_v19 = vcombine.low %v670_v2, %v674_v3 }
 0x11e   :  { %v275_v11 = vpack.c.bf16 %v267_v9, %v266_v4  ;;  %1192 = vmatprep.subr.bf16.mxu0 %v2025_v24  ;;  %v2032_v9 = vcombine.low %v662_v56, %v666_v57  ;;  %v2049_v24 = vcombine.high %v678_v13, %v682_v14  ;;  %v701_v57 = vld [vmem:[#allocation5 + $0x180] sm:$0xff]  ;;  %v656_v13 = vld [vmem:[#allocation5 + $0x18] sm:$0xff] }
 0x11f   :  { %v274_v12 = vpack.c.bf16 %v265_v10, %v264_v7  ;;  %1090 = vmatpush1.bf16.msra.mxu1 %v2062_v42  ;;  %v660_v14 = vld [vmem:[#allocation5 + $0x38] sm:$0xff] }
 0x121   :  { %2161 = vmatprep.mubr.msk.bf16.mxu1 %vm315_vm2, %v274_v12 }
 0x122   :  { %2162 = vmatmul.mubr.msk.bf16.gmra.mrb[12].mxu1 %vm315_vm2, %v275_v11  ;;  %v2041_v11 = vcombine.high %v670_v2, %v674_v3  ;;  %v710_v2 = vld [vmem:[#allocation5 + $0x1c8] sm:$0xff] }
 0x1dd   :  { %v2151_v44 = vpop.f32.mrb[0].mxu1 }
 0x1de   :  { %v383_v45 = vadd.f32 %v2151_v44, %v2479_v43  ;;  %v374_v46 = vpop.f32.mrb[1].mxu1  ;;  %v2065_v44 = vcombine.high %v694_v35, %v698_v36 }
 0x1df   :  { %v375_v47 = vadd.f32 %v2479_v43, %v374_v46  ;;  %v2152_v48 = vpop.f32.mrb[2].mxu1 }
 0x1e0   :  { %v386_v49 = vadd.f32 %v2152_v48, %v2479_v43  ;;  %v377_v50 = vpop.f32.mrb[3].mxu1  ;;  %v439_v52 = vmax.f32 %v383_v45, 0.0 }
 0x1e1   :  { %v378_v51 = vadd.f32 %v2479_v43, %v377_v50  ;;  %v437_v54 = vmax.f32 %v375_v47, 0.0 }
 0x1e2   :  { %v440_v53 = vmax.f32 %v386_v49, 0.0 }
 0x1e3   :  { %v438_v55 = vmax.f32 %v378_v51, 0.0 }
 0x1e4   :  { %v454_v58 = vpack.c.bf16 %v440_v53, %v439_v52  ;;  %v2064_v52 = vcombine.low %v694_v35, %v698_v36 }
 0x1e5   :  { %v453_v59 = vpack.c.bf16 %v438_v55, %v437_v54  ;;  %v2155_v60 = vpop.f32.mrb[4].mxu1 }
 0x1e6   :  { %v399_v61 = vadd.f32 %v2155_v60, %v2479_v43  ;;  %v390_v62 = vpop.f32.mrb[5].mxu1 }
 0x1e7   :  { %v391_v0 = vadd.f32 %v2479_v43, %v390_v62  ;;  %v2156_v1 = vpop.f32.mrb[6].mxu1  ;;  %2181 = vmatprep.mubr.bf16.mxu0 %v453_v59  ;;  %v702_v59 = vld [vmem:[#allocation5 + $0x188] sm:$0xff] }
 0x1e8   :  { %v443_v4 = vmax.f32 %v399_v61, 0.0  ;;  %v402_v5 = vadd.f32 %v2156_v1, %v2479_v43  ;;  %v393_v6 = vpop.f32.mrb[7].mxu1  ;;  %2182 = vmatmul.mubr.bf16.vlgmr.msra.gmra.mrb[16].mxu0 %v454_v58  ;;  %v705_v58 = vld [vmem:[#allocation5 + $0x1a0] sm:$0xff]  ;;  %v706_v61 = vld [vmem:[#allocation5 + $0x1a8] sm:$0xff] }
 0x1e9   :  { %v441_v7 = vmax.f32 %v391_v0, 0.0  ;;  %v394_v8 = vadd.f32 %v2479_v43, %v393_v6  ;;  %1193 = vmatpush1.bf16.msra.mxu0 %v2024_v23  ;;  %v686_v23 = vld [vmem:[#allocation5 + $0x108] sm:$0xff]  ;;  %v2071_v60 = vcombine.high %v701_v57, %v705_v58  ;;  %v2070_v62 = vcombine.low %v701_v57, %v705_v58  ;;  %v713_v1 = vld [vmem:[#allocation5 + $0x1e0] sm:$0xff]  ;;  %v679_v58 = vld [vmem:[#allocation5 + $0xd0] sm:$0xff] }
 0x1ea   :  { %v444_v10 = vmax.f32 %v402_v5, 0.0  ;;  %1194 = vmatprep.subr.bf16.mxu0 %v2033_v63  ;;  %v2057_v33 = vcombine.high %v686_v23, %v690_v25  ;;  %v2056_v40 = vcombine.low %v686_v23, %v690_v25  ;;  %v2072_v63 = vcombine.low %v702_v59, %v706_v61 }
 0x1eb   :  { %v442_v12 = vmax.f32 %v394_v8, 0.0  ;;  %v2073_v0 = vcombine.high %v702_v59, %v706_v61  ;;  %1091 = vmatprep.subr.bf16.mxu1 %v2071_v60  ;;  %v2321_v8 = vmov 0   ;;  %v683_v59 = vld [vmem:[#allocation5 + $0xf0] sm:$0xff]  ;;  %v680_v61 = vld [vmem:[#allocation5 + $0xd8] sm:$0xff] }
 0x1ec   :  { %v456_v15 = vpack.c.bf16 %v444_v10, %v443_v4  ;;  %1092 = vmatpush1.bf16.msra.mxu1 %v2070_v62  ;;  %v714_v4 = vld [vmem:[#allocation5 + $0x1e8] sm:$0xff]  ;;  %1111 = vmatprep.mubr.bf16.mxu1 %v2321_v8  ;;  %v659_v10 = vld [vmem:[#allocation5 + $0x30] sm:$0xff]  ;;  %v684_v62 = vld [vmem:[#allocation5 + $0xf8] sm:$0xff] }
 0x1ed   :  { %v455_v16 = vpack.c.bf16 %v442_v12, %v441_v7  ;;  %v2159_v18 = vpop.f32.mrb[8].mxu1  ;;  %1195 = vmatpush1.bf16.msra.mxu0 %v2032_v9  ;;  %v2080_v6 = vcombine.low %v710_v2, %v714_v4  ;;  %v2081_v7 = vcombine.high %v710_v2, %v714_v4  ;;  %v655_v9 = vld [vmem:[#allocation5 + $0x10] sm:$0xff]  ;;  %v2051_v4 = vcombine.high %v679_v58, %v683_v59 }
 0x1ee   :  { %v415_v21 = vadd.f32 %v2159_v18, %v2479_v43  ;;  %v406_v22 = vpop.f32.mrb[9].mxu1  ;;  %1196 = vmatprep.subr.bf16.mxu0 %v2041_v11  ;;  %v2026_v11 = vcombine.low %v655_v9, %v659_v10  ;;  %v2027_v12 = vcombine.high %v655_v9, %v659_v10  ;;  %v2510_v18 = vld [vmem:[%s2871_s6] ss:$0 sm:$0xff]  ;;  %v687_v9 = vld [vmem:[#allocation5 + $0x110] sm:$0xff] }
 0x1ef   :  { %2185 = vmatprep.mubr.bf16.mxu0 %v455_v16  ;;  %v407_v17 = vadd.f32 %v2479_v43, %v406_v22  ;;  %v2160_v20 = vpop.f32.mrb[10].mxu1  ;;  %v2504_v16 = vcombine.high %v656_v13, %v660_v14  ;;  %v691_v10 = vld [vmem:[#allocation5 + $0x130] sm:$0xff] }
 0x1f0   :  { %2186 = vmatmul.mubr.bf16.gmra.mrb[20].mxu0 %v456_v15  ;;  %v447_v26 = vmax.f32 %v415_v21, 0.0  ;;  %v418_v27 = vadd.f32 %v2160_v20, %v2479_v43  ;;  %v409_v28 = vpop.f32.mrb[11].mxu1  ;;  %v2502_v15 = vcombine.low %v656_v13, %v660_v14 }
 0x1f1   :  { %v445_v29 = vmax.f32 %v407_v17, 0.0  ;;  %v410_v30 = vadd.f32 %v2479_v43, %v409_v28  ;;  %1197 = vmatpush1.bf16.msra.mxu0 %v2040_v19  ;;  %v663_v28 = vld [vmem:[#allocation5 + $0x50] sm:$0xff] }
 0x1f2   :  { %v448_v32 = vmax.f32 %v418_v27, 0.0  ;;  %1198 = vmatprep.subr.bf16.mxu0 %v2049_v24 }
 0x1f3   :  { %v446_v34 = vmax.f32 %v410_v30, 0.0 }
 0x1f4   :  { %v458_v37 = vpack.c.bf16 %v448_v32, %v447_v26 }
 0x1f5   :  { %v457_v38 = vpack.c.bf16 %v446_v34, %v445_v29  ;;  %v2163_v39 = vpop.f32.mrb[12].mxu1  ;;  %1199 = vmatpush1.bf16.msra.mxu0 %v2048_v31  ;;  %v667_v29 = vld [vmem:[#allocation5 + $0x70] sm:$0xff]  ;;  %v668_v34 = vld [vmem:[#allocation5 + $0x78] sm:$0xff] }
 0x1f6   :  { %v431_v41 = vadd.f32 %v2163_v39, %v2479_v43  ;;  %v422_v42 = vpop.f32.mrb[13].mxu1  ;;  %1200 = vmatprep.subr.bf16.mxu0 %v2057_v33  ;;  %v664_v33 = vld [vmem:[#allocation5 + $0x58] sm:$0xff] }
 0x1f7   :  { %2189 = vmatprep.mubr.bf16.mxu0 %v457_v38  ;;  %v423_v45 = vadd.f32 %v2479_v43, %v422_v42  ;;  %v2164_v46 = vpop.f32.mrb[14].mxu1 }
 0x1f8   :  { %2190 = vmatmul.mubr.bf16.gmra.mrb[24].mxu0 %v458_v37  ;;  %v451_v47 = vmax.f32 %v431_v41, 0.0  ;;  %v434_v48 = vadd.f32 %v2164_v46, %v2479_v43  ;;  %v425_v49 = vpop.f32.mrb[15].mxu1  ;;  %v2035_v37 = vcombine.high %v663_v28, %v667_v29  ;;  %v675_v41 = vld [vmem:[#allocation5 + $0xb0] sm:$0xff] }
 0x1f9   :  { %v449_v50 = vmax.f32 %v423_v45, 0.0  ;;  %v426_v51 = vadd.f32 %v2479_v43, %v425_v49  ;;  %1201 = vmatpush1.bf16.msra.mxu0 %v2056_v40  ;;  %v709_v43 = vld [vmem:[#allocation5 + $0x1c0] sm:$0xff]  ;;  %v671_v40 = vld [vmem:[#allocation5 + $0x90] sm:$0xff]  ;;  %v2524_v45 = vcombine.high %v664_v33, %v668_v34 }
 0x1fa   :  { %v452_v53 = vmax.f32 %v434_v48, 0.0  ;;  %1202 = vmatprep.subr.bf16.mxu0 %v2065_v44  ;;  %v2079_v3 = vcombine.high %v709_v43, %v713_v1  ;;  %v2078_v5 = vcombine.low %v709_v43, %v713_v1  ;;  %v2034_v48 = vcombine.low %v663_v28, %v667_v29  ;;  %v699_v28 = vld [vmem:[#allocation5 + $0x170] sm:$0xff] }
 0x1fb   :  { %v450_v54 = vmax.f32 %v426_v51, 0.0  ;;  %v2042_v43 = vcombine.low %v671_v40, %v675_v41 }
 0x1fc   :  { %v460_v55 = vpack.c.bf16 %v452_v53, %v451_v47  ;;  %1093 = vmatprep.subr.bf16.mxu1 %v2079_v3  ;;  %v2531_v53 = vcombine.low %v664_v33, %v668_v34 }
 0x1fd   :  { %v459_v56 = vpack.c.bf16 %v450_v54, %v449_v50  ;;  %1203 = vmatpush1.bf16.msra.mxu0 %v2064_v52  ;;  %1094 = vmatpush1.bf16.msra.mxu1 %v2078_v5  ;;  %v2043_v50 = vcombine.high %v671_v40, %v675_v41  ;;  %v672_v54 = vld [vmem:[#allocation5 + $0x98] sm:$0xff] }
 0x1fe   :  { %1204 = vmatprep.subr.bf16.mxu0 %v2073_v0  ;;  %1305 = vmatprep.subr.bf16.mxu1 %v2027_v12 }
 0x1ff   :  { %2193 = vmatprep.mubr.bf16.mxu0 %v459_v56 }
 0x200   :  { %2194 = vmatmul.mubr.bf16.gmra.mrb[28].mxu0 %v460_v55  ;;  %v676_v55 = vld [vmem:[#allocation5 + $0xb8] sm:$0xff] }
 0x201   :  { %1205 = vmatpush1.bf16.msra.mxu0 %v2072_v63  ;;  %1224 = vmatprep.mubr.bf16.mxu0 %v2321_v8  ;;  %v2538_v1 = vcombine.high %v672_v54, %v676_v55  ;;  %v2542_v5 = vcombine.low %v672_v54, %v676_v55 }
 0x202   :  { %1206 = vmatprep.subr.bf16.mxu0 %v2081_v7 }
 0x205   :  { %1207 = vmatpush1.bf16.msra.mxu0 %v2080_v6 }
 0x206   :  { %1418 = vmatprep.subr.bf16.mxu0 %v2504_v16 }
 0x2bb   :  { %v2183_v19 = vpop.f32.mrb[16].mxu0 }
 0x2bc   :  { %v575_v21 = vadd.f32 %v2183_v19, %v2510_v18  ;;  %v566_v22 = vpop.f32.mrb[17].mxu0 }
 0x2bd   :  { %v567_v24 = vadd.f32 %v2510_v18, %v566_v22  ;;  %v2184_v17 = vpop.f32.mrb[18].mxu0  ;;  %v2050_v22 = vcombine.low %v679_v58, %v683_v59  ;;  %v704_v59 = vld [vmem:[#allocation5 + $0x198] sm:$0xff] }
 0x2be   :  { %v578_v20 = vadd.f32 %v2184_v17, %v2510_v18  ;;  %v569_v23 = vpop.f32.mrb[19].mxu0  ;;  %v631_v26 = vmax.f32 %v575_v21, 0.0  ;;  %v2059_v17 = vcombine.high %v687_v9, %v691_v10 }
 0x2bf   :  { %v570_v25 = vadd.f32 %v2510_v18, %v569_v23  ;;  %v629_v30 = vmax.f32 %v567_v24, 0.0  ;;  %v688_v23 = vld [vmem:[#allocation5 + $0x118] sm:$0xff] }
 0x2c0   :  { %v632_v27 = vmax.f32 %v578_v20, 0.0  ;;  %v2555_v20 = vcombine.low %v680_v61, %v684_v62 }
 0x2c1   :  { %v630_v31 = vmax.f32 %v570_v25, 0.0  ;;  %v692_v25 = vld [vmem:[#allocation5 + $0x138] sm:$0xff] }
 0x2c2   :  { %v2516_v32 = vpack.c.bf16 %v632_v27, %v631_v26  ;;  %v695_v27 = vld [vmem:[#allocation5 + $0x150] sm:$0xff]  ;;  %v2566_v41 = vcombine.low %v688_v23, %v692_v25 }
 0x2c3   :  { %v2518_v35 = vpack.c.bf16 %v630_v31, %v629_v30  ;;  %v2187_v36 = vpop.f32.mrb[20].mxu0  ;;  %v696_v30 = vld [vmem:[#allocation5 + $0x158] sm:$0xff]  ;;  %v2067_v40 = vcombine.high %v695_v27, %v699_v28  ;;  %v2066_v55 = vcombine.low %v695_v27, %v699_v28 }
 0x2c4   :  { %v591_v38 = vadd.f32 %v2187_v36, %v2510_v18  ;;  %v582_v39 = vpop.f32.mrb[21].mxu0  ;;  %v700_v31 = vld [vmem:[#allocation5 + $0x178] sm:$0xff]  ;;  %v2058_v36 = vcombine.low %v687_v9, %v691_v10 }
 0x2c5   :  { %v583_v42 = vadd.f32 %v2510_v18, %v582_v39  ;;  %v2188_v44 = vpop.f32.mrb[22].mxu0  ;;  %1112 = vmatmul.mubr.bf16.vlgmr.msra.gmra.mrb[16].mxu1 %v2518_v35  ;;  %1225 = vmatmul.mubr.bf16.vlgmr.msra.gmra.mrb[32].mxu0 %v2518_v35  ;;  %v2579_v58 = vcombine.low %v696_v30, %v700_v31 }
 0x2c6   :  { %v594_v46 = vadd.f32 %v2188_v44, %v2510_v18  ;;  %1306 = vmatpush1.bf16.msra.mxu1 %v2026_v11  ;;  %v585_v47 = vpop.f32.mrb[23].mxu0  ;;  %1121 = vmatprep.mubr.bf16.mxu1 %v2321_v8  ;;  %v635_v51 = vmax.f32 %v591_v38, 0.0  ;;  %v2547_v11 = vcombine.high %v680_v61, %v684_v62  ;;  %v708_v61 = vld [vmem:[#allocation5 + $0x1b8] sm:$0xff] }
 0x2c7   :  { %v586_v49 = vadd.f32 %v2510_v18, %v585_v47  ;;  %1234 = vmatprep.mubr.bf16.mxu0 %v2321_v8  ;;  %1307 = vmatprep.subr.bf16.mxu1 %v2035_v37  ;;  %v633_v56 = vmax.f32 %v583_v42, 0.0  ;;  %v2562_v37 = vcombine.high %v688_v23, %v692_v25  ;;  %v707_v47 = vld [vmem:[#allocation5 + $0x1b0] sm:$0xff]  ;;  %v2076_v10 = vcombine.low %v704_v59, %v708_v61 }
 0x2c8   :  { %v636_v52 = vmax.f32 %v594_v46, 0.0  ;;  %1419 = vmatpush1.bf16.msra.mxu0 %v2502_v15  ;;  %v703_v46 = vld [vmem:[#allocation5 + $0x190] sm:$0xff] }
 0x2c9   :  { %v634_v57 = vmax.f32 %v586_v49, 0.0  ;;  %1420 = vmatprep.subr.bf16.mxu0 %v2524_v45 }
 0x2ca   :  { %v2534_v60 = vpack.c.bf16 %v636_v52, %v635_v51  ;;  %1308 = vmatpush1.bf16.msra.mxu1 %v2034_v48  ;;  %v2571_v48 = vcombine.high %v696_v30, %v700_v31 }
 0x2cb   :  { %v2536_v63 = vpack.c.bf16 %v634_v57, %v633_v56  ;;  %v2191_v0 = vpop.f32.mrb[24].mxu0  ;;  %1309 = vmatprep.subr.bf16.mxu1 %v2043_v50  ;;  %v2075_v57 = vcombine.high %v703_v46, %v707_v47 }
 0x2cc   :  { %v607_v2 = vadd.f32 %v2191_v0, %v2510_v18  ;;  %v598_v3 = vpop.f32.mrb[25].mxu0  ;;  %1421 = vmatpush1.bf16.msra.mxu0 %v2531_v53  ;;  %v711_v0 = vld [vmem:[#allocation5 + $0x1d0] sm:$0xff] }
 0x2cd   :  { %1122 = vmatmul.mubr.bf16.gmra.mrb[20].mxu1 %v2516_v32  ;;  %1235 = vmatmul.mubr.bf16.gmra.mrb[36].mxu0 %v2516_v32  ;;  %v599_v6 = vadd.f32 %v2510_v18, %v598_v3  ;;  %v2192_v7 = vpop.f32.mrb[26].mxu0  ;;  %v716_v3 = vld [vmem:[#allocation5 + $0x1f8] sm:$0xff] }
 0x2ce   :  { %v639_v12 = vmax.f32 %v607_v2, 0.0  ;;  %v610_v13 = vadd.f32 %v2192_v7, %v2510_v18  ;;  %v601_v14 = vpop.f32.mrb[27].mxu0  ;;  %1131 = vmatprep.mubr.bf16.mxu1 %v2321_v8  ;;  %1244 = vmatprep.mubr.bf16.mxu0 %v2321_v8  ;;  %v2077_v7 = vcombine.high %v704_v59, %v708_v61 }
 0x2cf   :  { %v637_v19 = vmax.f32 %v599_v6, 0.0  ;;  %v602_v21 = vadd.f32 %v2510_v18, %v601_v14  ;;  %1310 = vmatpush1.bf16.msra.mxu1 %v2042_v43  ;;  %1422 = vmatprep.subr.bf16.mxu0 %v2538_v1  ;;  %v715_v43 = vld [vmem:[#allocation5 + $0x1f0] sm:$0xff]  ;;  %v2074_v6 = vcombine.low %v703_v46, %v707_v47 }
 0x2d0   :  { %v640_v24 = vmax.f32 %v610_v13, 0.0  ;;  %1311 = vmatprep.subr.bf16.mxu1 %v2051_v4  ;;  %1423 = vmatpush1.bf16.msra.mxu0 %v2542_v5  ;;  %v2083_v9 = vcombine.high %v711_v0, %v715_v43  ;;  %v2082_v13 = vcombine.low %v711_v0, %v715_v43 }
 0x2d1   :  { %v638_v26 = vmax.f32 %v602_v21, 0.0  ;;  %1424 = vmatprep.subr.bf16.mxu0 %v2547_v11 }
 0x2d2   :  { %v2558_v29 = vpack.c.bf16 %v640_v24, %v639_v12 }
 0x2d3   :  { %v2560_v33 = vpack.c.bf16 %v638_v26, %v637_v19  ;;  %1312 = vmatpush1.bf16.msra.mxu1 %v2050_v22  ;;  %v2195_v34 = vpop.f32.mrb[28].mxu0 }
 0x2d4   :  { %v623_v38 = vadd.f32 %v2195_v34, %v2510_v18  ;;  %v614_v39 = vpop.f32.mrb[29].mxu0  ;;  %1313 = vmatprep.subr.bf16.mxu1 %v2059_v17  ;;  %1425 = vmatpush1.bf16.msra.mxu0 %v2555_v20 }
 0x2d5   :  { %1132 = vmatmul.mubr.bf16.gmra.mrb[24].mxu1 %v2536_v63  ;;  %1245 = vmatmul.mubr.bf16.gmra.mrb[40].mxu0 %v2536_v63  ;;  %v615_v42 = vadd.f32 %v2510_v18, %v614_v39  ;;  %v2196_v44 = vpop.f32.mrb[30].mxu0 }
 0x2d6   :  { %1141 = vmatprep.mubr.bf16.mxu1 %v2321_v8  ;;  %1254 = vmatprep.mubr.bf16.mxu0 %v2321_v8  ;;  %v643_v49 = vmax.f32 %v623_v38, 0.0  ;;  %v626_v50 = vadd.f32 %v2196_v44, %v2510_v18  ;;  %v617_v51 = vpop.f32.mrb[31].mxu0 }
 0x2d7   :  { %v641_v52 = vmax.f32 %v615_v42, 0.0  ;;  %v618_v54 = vadd.f32 %v2510_v18, %v617_v51  ;;  %1314 = vmatpush1.bf16.msra.mxu1 %v2058_v36  ;;  %1426 = vmatprep.subr.bf16.mxu0 %v2562_v37  ;;  %v712_v18 = vld [vmem:[#allocation5 + $0x1d8] sm:$0xff] }
 0x2d8   :  { %v644_v56 = vmax.f32 %v626_v50, 0.0  ;;  %1315 = vmatprep.subr.bf16.mxu1 %v2067_v40  ;;  %1427 = vmatpush1.bf16.msra.mxu0 %v2566_v41  ;;  %v2085_v12 = vcombine.high %v712_v18, %v716_v3  ;;  %v2084_v14 = vcombine.low %v712_v18, %v716_v3 }
 0x2d9   :  { %v642_v62 = vmax.f32 %v618_v54, 0.0  ;;  %1428 = vmatprep.subr.bf16.mxu0 %v2571_v48 }
 0x2da   :  { %v2582_v2 = vpack.c.bf16 %v644_v56, %v643_v49 }
 0x2db   :  { %v2584_v4 = vpack.c.bf16 %v642_v62, %v641_v52  ;;  %1316 = vmatpush1.bf16.msra.mxu1 %v2066_v55 }
 0x2dc   :  { %1317 = vmatprep.subr.bf16.mxu1 %v2075_v57  ;;  %1429 = vmatpush1.bf16.msra.mxu0 %v2579_v58 }
 0x2dd   :  { %1142 = vmatmul.mubr.bf16.gmra.mrb[28].mxu1 %v2534_v60  ;;  %1255 = vmatmul.mubr.bf16.gmra.mrb[44].mxu0 %v2534_v60 }
 0x2de   :  { %1151 = vmatprep.mubr.bf16.mxu1 %v2321_v8  ;;  %1264 = vmatprep.mubr.bf16.mxu0 %v2321_v8 }
 0x2df   :  { %1318 = vmatpush1.bf16.msra.mxu1 %v2074_v6  ;;  %1430 = vmatprep.subr.bf16.mxu0 %v2077_v7 }
 0x2e0   :  { %1319 = vmatprep.subr.bf16.mxu1 %v2083_v9  ;;  %1431 = vmatpush1.bf16.msra.mxu0 %v2076_v10 }
 0x2e1   :  { %1432 = vmatprep.subr.bf16.mxu0 %v2085_v12 }
 0x2e3   :  { %1320 = vmatpush1.bf16.msra.mxu1 %v2082_v13 }
 0x2e4   :  { %1433 = vmatpush1.bf16.msra.mxu0 %v2084_v14  ;;  %2197 = vmatprep.subr.bf16.mxu1 %v2504_v16 }
 0x2e5   :  { %1152 = vmatmul.mubr.bf16.gmra.mrb[32].mxu1 %v2560_v33  ;;  %1265 = vmatmul.mubr.bf16.gmra.mrb[48].mxu0 %v2560_v33 }
 0x2e6   :  { %1161 = vmatprep.mubr.bf16.mxu1 %v2321_v8  ;;  %1274 = vmatprep.mubr.bf16.mxu0 %v2321_v8 }
 0x2ed   :  { %1162 = vmatmul.mubr.bf16.gmra.mrb[36].mxu1 %v2558_v29  ;;  %1275 = vmatmul.mubr.bf16.gmra.mrb[52].mxu0 %v2558_v29 }
 0x2ee   :  { %1171 = vmatprep.mubr.bf16.mxu1 %v2321_v8  ;;  %1284 = vmatprep.mubr.bf16.mxu0 %v2321_v8 }
 0x2f5   :  { %1172 = vmatmul.mubr.bf16.gmra.mrb[40].mxu1 %v2584_v4  ;;  %1285 = vmatmul.mubr.bf16.gmra.mrb[56].mxu0 %v2584_v4 }
 0x2f6   :  { %1181 = vmatprep.mubr.bf16.mxu1 %v2321_v8  ;;  %1294 = vmatprep.mubr.bf16.mxu0 %v2321_v8 }
 0x2fd   :  { %1182 = vmatmul.mubr.bf16.gmra.mrb[44].mxu1 %v2582_v2  ;;  %1295 = vmatmul.mubr.bf16.gmra.mrb[60].mxu0 %v2582_v2 }
 0x2fe   :  { %1337 = vmatprep.mubr.bf16.mxu1 %v2321_v8  ;;  %1450 = vmatprep.mubr.bf16.mxu0 %v2321_v8 }
 0x305   :  { %1338 = vmatmul.mubr.bf16.vlgmr.msra.gmra.mrb[48].mxu1 %v2518_v35  ;;  %1451 = vmatmul.mubr.bf16.vlgmr.msra.gmra.mrb[64].mxu0 %v2518_v35 }
 0x306   :  { %2205 = vmatpush1.bf16.msra.mxu1 %v2502_v15  ;;  %1347 = vmatprep.mubr.bf16.mxu1 %v2321_v8  ;;  %v719_v15 = vlaneseq }
 0x307   :  { %2198 = vmatprep.subr.bf16.mxu1 %v2524_v45  ;;  %1460 = vmatprep.mubr.bf16.mxu0 %v2321_v8  ;;  %v2656_v45 = vld [vmem:[%s2873_s8] sm:$0xff]  ;;  %s2323_s8 = smov [#allocation7]  }
 0x308   :  { %v2649_v16 = vshrl.u32 %v719_v15, 7  ;;  %s1973_s26 = sshll.u32 %s2323_s8, 4  ;;  %s1974_s26 = int_to_ptr.vmem [resolvable:$true] %s1973_s26 }
 0x309   :  { %s2287_s27 = scalar_lea.vmem %s1974_s26, 256  ;;  %p2292_p3 = scmp.lt.s32.totalorder %s1974_s26, %s1974_s26 }
 0x30a   :  { %2206 = vmatpush1.bf16.msra.mxu1 %v2531_v53  ;;  %v729_v35 = vsub.s32 2, %v2649_v16  ;;  %v725_v53 = vsub.s32 1, %v2649_v16  ;;  %p2288_p2 = scmp.ne.s32.totalorder %s1974_s26, %s2287_s27  ;;  %p2293_p4 = scmp.lt.s32.totalorder %s2287_s27, %s2287_s27 }
 0x30b   :  { %2199 = vmatprep.subr.bf16.mxu1 %v2538_v1 }
 0x30c   :  { %p2294_p5 = por %p2293_p4, %p2292_p3 }
 0x30d   :  { %1348 = vmatmul.mubr.bf16.gmra.mrb[52].mxu1 %v2516_v32  ;;  %1461 = vmatmul.mubr.bf16.gmra.mrb[68].mxu0 %v2516_v32  ;;  %v721_v32 = vsub.s32 0, %v2649_v16 }
 0x30e   :  { %1357 = vmatprep.mubr.bf16.mxu1 %v2321_v8  ;;  %1470 = vmatprep.mubr.bf16.mxu0 %v2321_v8  ;;  %p2295_p6 = pnand %p2294_p5, %p2288_p2 }
 0x30f   :  { %2207 = vmatpush1.bf16.msra.mxu1 %v2542_v5 }
 0x310   :  { %2200 = vmatprep.subr.bf16.mxu1 %v2547_v11  ;;  %v2667_v11 = vrot.slane %v2656_v45, %v725_v53 }
 0x313   :  { %2208 = vmatpush1.bf16.msra.mxu1 %v2555_v20 }
 0x314   :  { %2201 = vmatprep.subr.bf16.mxu1 %v2562_v37 }
 0x315   :  { %1358 = vmatmul.mubr.bf16.gmra.mrb[56].mxu1 %v2536_v63  ;;  %1471 = vmatmul.mubr.bf16.gmra.mrb[72].mxu0 %v2536_v63  ;;  %v2664_v63 = vrot.slane %v2656_v45, %v729_v35 }
 0x316   :  { %1367 = vmatprep.mubr.bf16.mxu1 %v2321_v8  ;;  %1480 = vmatprep.mubr.bf16.mxu0 %v2321_v8 }
 0x317   :  { %2209 = vmatpush1.bf16.msra.mxu1 %v2566_v41 }
 0x318   :  { %2202 = vmatprep.subr.bf16.mxu1 %v2571_v48 }
 0x31b   :  { %2210 = vmatpush1.bf16.msra.mxu1 %v2579_v58 }
 0x31c   :  { %2203 = vmatprep.subr.bf16.mxu1 %v2077_v7 }
 0x31d   :  { %1368 = vmatmul.mubr.bf16.gmra.mrb[60].mxu1 %v2534_v60  ;;  %1481 = vmatmul.mubr.bf16.gmra.mrb[76].mxu0 %v2534_v60  ;;  %v733_v60 = vsub.s32 3, %v2649_v16 }
 0x31e   :  { %1377 = vmatprep.mubr.bf16.mxu1 %v2321_v8  ;;  %1490 = vmatprep.mubr.bf16.mxu0 %v2321_v8 }
 0x31f   :  { %2211 = vmatpush1.bf16.msra.mxu1 %v2076_v10  ;;  %v2670_v19 = vrot.slane %v2656_v45, %v733_v60 }
 0x320   :  { %2204 = vmatprep.subr.bf16.mxu1 %v2085_v12 }
 0x323   :  { %2212 = vmatpush1.bf16.msra.mxu1 %v2084_v14 }
 0x325   :  { %1378 = vmatmul.mubr.bf16.gmra.mrb[64].mxu1 %v2560_v33  ;;  %1491 = vmatmul.mubr.bf16.gmra.mrb[80].mxu0 %v2560_v33 }
 0x326   :  { %1387 = vmatprep.mubr.bf16.mxu1 %v2321_v8  ;;  %1500 = vmatprep.mubr.bf16.mxu0 %v2321_v8 }
 0x32d   :  { %1388 = vmatmul.mubr.bf16.gmra.mrb[68].mxu1 %v2558_v29  ;;  %1501 = vmatmul.mubr.bf16.gmra.mrb[84].mxu0 %v2558_v29 }
 0x32e   :  { %1397 = vmatprep.mubr.bf16.mxu1 %v2321_v8  ;;  %1510 = vmatprep.mubr.bf16.mxu0 %v2321_v8 }
 0x335   :  { %1398 = vmatmul.mubr.bf16.gmra.mrb[72].mxu1 %v2584_v4  ;;  %1511 = vmatmul.mubr.bf16.gmra.mrb[88].mxu0 %v2584_v4 }
 0x336   :  { %1407 = vmatprep.mubr.bf16.mxu1 %v2321_v8 }
 0x33d   :  { %1408 = vmatmul.mubr.bf16.gmra.mrb[76].mxu1 %v2582_v2 }
 0x33e   :  { %1520 = vmatprep.mubr.bf16.mxu1 %v2321_v8  ;;  %v2661_v8 = vrot.slane %v2656_v45, %v721_v32 }
 0x345   :  { %1521 = vmatmul.mubr.bf16.vlgmr.msra.gmra.mrb[80].mxu1 %v2582_v2 }
 0x398   :  { %v1113_v1 = vpop.f32.mrb[16].mxu1  ;;  %v1226_v5 = vpop.f32.mrb[32].mxu0 }
 0x399   :  { %v1115_v21 = vpop.f32.mrb[17].mxu1  ;;  %v1228_v22 = vpop.f32.mrb[33].mxu0  ;;  %v1114_v20 = vadd.f32 %v1113_v1, %v2661_v8  ;;  %v1227_v23 = vadd.f32 %v1226_v5, %v2664_v63 }
 0x39a   :  { %v1117_v24 = vpop.f32.mrb[18].mxu1  ;;  %v1230_v17 = vpop.f32.mrb[34].mxu0  ;;  %v1116_v29 = vadd.f32 %v1115_v21, %v2667_v11  ;;  %v1229_v30 = vadd.f32 %v1228_v22, %v2670_v19 }
 0x39b   :  { %v1118_v25 = vadd.f32 %v1117_v24, %v2661_v8  ;;  %v1231_v26 = vadd.f32 %v1230_v17, %v2664_v63  ;;  %v1119_v27 = vpop.f32.mrb[19].mxu1  ;;  %v1232_v28 = vpop.f32.mrb[35].mxu0 }
 0x39c   :  { %v1120_v31 = vadd.f32 %v1119_v27, %v2667_v11  ;;  %v1233_v33 = vadd.f32 %v1232_v28, %v2670_v19 }
 0x39d   :  { %v1531_v34 = vmax.f32 %v1114_v20, %v1118_v25  ;;  %v1557_v36 = vmax.f32 %v1227_v23, %v1231_v26 }
 0x39e   :  { %v1544_v37 = vmax.f32 %v1116_v29, %v1120_v31  ;;  %v1570_v38 = vmax.f32 %v1229_v30, %v1233_v33 }
 0x3a0   :  { %v1123_v39 = vpop.f32.mrb[20].mxu1  ;;  %v1236_v40 = vpop.f32.mrb[36].mxu0 }
 0x3a1   :  { %v1124_v41 = vadd.f32 %v1123_v39, %v2661_v8  ;;  %v1237_v42 = vadd.f32 %v1236_v40, %v2664_v63  ;;  %v1125_v44 = vpop.f32.mrb[21].mxu1  ;;  %v1238_v46 = vpop.f32.mrb[37].mxu0  ;;  %v2322_v39 = vmov 1983009808  }
 0x3a2   :  { %v1126_v47 = vadd.f32 %v1125_v44, %v2667_v11  ;;  %v1239_v48 = vadd.f32 %v1238_v46, %v2670_v19  ;;  %v1127_v49 = vpop.f32.mrb[22].mxu1  ;;  %v1240_v50 = vpop.f32.mrb[38].mxu0  ;;  %v1762_v40 = vunpack.c.l.s4 %v2322_v39 }
 0x3a3   :  { %v1532_v51 = vmax.f32 %v1531_v34, %v1124_v41  ;;  %v1558_v52 = vmax.f32 %v1557_v36, %v1237_v42  ;;  %v1128_v54 = vadd.f32 %v1127_v49, %v2661_v8  ;;  %v1241_v55 = vadd.f32 %v1240_v50, %v2664_v63  ;;  %v1129_v56 = vpop.f32.mrb[23].mxu1  ;;  %v1242_v57 = vpop.f32.mrb[39].mxu0 }
 0x3a4   :  { %v1545_v58 = vmax.f32 %v1544_v37, %v1126_v47  ;;  %v1571_v59 = vmax.f32 %v1570_v38, %v1239_v48  ;;  %v1130_v61 = vadd.f32 %v1129_v56, %v2667_v11  ;;  %v1243_v62 = vadd.f32 %v1242_v57, %v2670_v19 }
 0x3a5   :  { %v1533_v0 = vmax.f32 %v1532_v51, %v1128_v54  ;;  %v1559_v43 = vmax.f32 %v1558_v52, %v1241_v55 }
 0x3a6   :  { %v1546_v2 = vmax.f32 %v1545_v58, %v1130_v61  ;;  %v1572_v18 = vmax.f32 %v1571_v59, %v1243_v62  ;;  %v1763_v62 = vunpack.c.0.s8 %v1762_v40 }
 0x3a8   :  { %v1133_v3 = vpop.f32.mrb[24].mxu1  ;;  %v1246_v4 = vpop.f32.mrb[40].mxu0 }
 0x3a9   :  { %v1134_v6 = vadd.f32 %v1133_v3, %v2661_v8  ;;  %v1247_v7 = vadd.f32 %v1246_v4, %v2664_v63  ;;  %v1135_v9 = vpop.f32.mrb[25].mxu1  ;;  %v1248_v10 = vpop.f32.mrb[41].mxu0 }
 0x3aa   :  { %v1136_v12 = vadd.f32 %v1135_v9, %v2667_v11  ;;  %v1249_v13 = vadd.f32 %v1248_v10, %v2670_v19  ;;  %v1137_v14 = vpop.f32.mrb[26].mxu1  ;;  %v1250_v15 = vpop.f32.mrb[42].mxu0 }
 0x3ab   :  { %v1534_v32 = vmax.f32 %v1533_v0, %v1134_v6  ;;  %v1560_v35 = vmax.f32 %v1559_v43, %v1247_v7  ;;  %v1138_v53 = vadd.f32 %v1137_v14, %v2661_v8  ;;  %v1251_v60 = vadd.f32 %v1250_v15, %v2664_v63  ;;  %v1139_v1 = vpop.f32.mrb[27].mxu1  ;;  %v1252_v5 = vpop.f32.mrb[43].mxu0 }
 0x3ac   :  { %v1547_v21 = vmax.f32 %v1546_v2, %v1136_v12  ;;  %v1573_v22 = vmax.f32 %v1572_v18, %v1249_v13  ;;  %v1140_v24 = vadd.f32 %v1139_v1, %v2667_v11  ;;  %v1253_v17 = vadd.f32 %v1252_v5, %v2670_v19 }
 0x3ad   :  { %v1535_v20 = vmax.f32 %v1534_v32, %v1138_v53  ;;  %v1561_v23 = vmax.f32 %v1560_v35, %v1251_v60 }
 0x3ae   :  { %v1548_v25 = vmax.f32 %v1547_v21, %v1140_v24  ;;  %v1574_v26 = vmax.f32 %v1573_v22, %v1253_v17 }
 0x3b0   :  { %v1143_v27 = vpop.f32.mrb[28].mxu1  ;;  %v1256_v28 = vpop.f32.mrb[44].mxu0 }
 0x3b1   :  { %v1144_v29 = vadd.f32 %v1143_v27, %v2661_v8  ;;  %v1257_v30 = vadd.f32 %v1256_v28, %v2664_v63  ;;  %v1145_v31 = vpop.f32.mrb[29].mxu1  ;;  %v1258_v33 = vpop.f32.mrb[45].mxu0 }
 0x3b2   :  { %v1146_v34 = vadd.f32 %v1145_v31, %v2667_v11  ;;  %v1259_v36 = vadd.f32 %v1258_v33, %v2670_v19  ;;  %v1147_v37 = vpop.f32.mrb[30].mxu1  ;;  %v1260_v38 = vpop.f32.mrb[46].mxu0 }
 0x3b3   :  { %v1536_v41 = vmax.f32 %v1535_v20, %v1144_v29  ;;  %v1562_v42 = vmax.f32 %v1561_v23, %v1257_v30  ;;  %v1148_v44 = vadd.f32 %v1147_v37, %v2661_v8  ;;  %v1261_v46 = vadd.f32 %v1260_v38, %v2664_v63  ;;  %v1149_v47 = vpop.f32.mrb[31].mxu1  ;;  %v1262_v48 = vpop.f32.mrb[47].mxu0 }
 0x3b4   :  { %v1549_v49 = vmax.f32 %v1548_v25, %v1146_v34  ;;  %v1575_v50 = vmax.f32 %v1574_v26, %v1259_v36  ;;  %v1150_v51 = vadd.f32 %v1149_v47, %v2667_v11  ;;  %v1263_v52 = vadd.f32 %v1262_v48, %v2670_v19 }
 0x3b5   :  { %v1537_v54 = vmax.f32 %v1536_v41, %v1148_v44  ;;  %v1563_v55 = vmax.f32 %v1562_v42, %v1261_v46  ;;  %v2713_v37 = vsub.s32 %v1763_v62, %v2649_v16 }
 0x3b6   :  { %v1550_v56 = vmax.f32 %v1549_v49, %v1150_v51  ;;  %v1576_v57 = vmax.f32 %v1575_v50, %v1263_v52 }
 0x3b7   :  { %v1538_v58 = vrot.slane %v1537_v54, 4  ;;  %v1564_v59 = vrot.slane %v1563_v55, 4 }
 0x3b8   :  { %v1551_v61 = vrot.slane %v1550_v56, 4  ;;  %v1577_v0 = vrot.slane %v1576_v57, 4  ;;  %v1153_v43 = vpop.f32.mrb[32].mxu1  ;;  %v1266_v2 = vpop.f32.mrb[48].mxu0 }
 0x3b9   :  { %v1539_v18 = vmax.f32 %v1537_v54, %v1538_v58  ;;  %v1565_v3 = vmax.f32 %v1563_v55, %v1564_v59  ;;  %v1154_v4 = vadd.f32 %v1153_v43, %v2661_v8  ;;  %v1267_v6 = vadd.f32 %v1266_v2, %v2664_v63  ;;  %v1155_v7 = vpop.f32.mrb[33].mxu1  ;;  %v1268_v9 = vpop.f32.mrb[49].mxu0 }
 0x3ba   :  { %v1552_v10 = vmax.f32 %v1550_v56, %v1551_v61  ;;  %v1578_v12 = vmax.f32 %v1576_v57, %v1577_v0  ;;  %v1156_v13 = vadd.f32 %v1155_v7, %v2667_v11  ;;  %v1269_v14 = vadd.f32 %v1268_v9, %v2670_v19  ;;  %v1157_v15 = vpop.f32.mrb[34].mxu1  ;;  %v1270_v32 = vpop.f32.mrb[50].mxu0 }
 0x3bb   :  { %v1540_v35 = vrot.slane %v1539_v18, 2  ;;  %v1566_v53 = vrot.slane %v1565_v3, 2  ;;  %v1158_v60 = vadd.f32 %v1157_v15, %v2661_v8  ;;  %v1271_v1 = vadd.f32 %v1270_v32, %v2664_v63  ;;  %v1159_v5 = vpop.f32.mrb[35].mxu1  ;;  %v1272_v21 = vpop.f32.mrb[51].mxu0 }
 0x3bc   :  { %v1553_v22 = vrot.slane %v1552_v10, 2  ;;  %v1579_v24 = vrot.slane %v1578_v12, 2  ;;  %v1160_v17 = vadd.f32 %v1159_v5, %v2667_v11  ;;  %v1273_v20 = vadd.f32 %v1272_v21, %v2670_v19 }
 0x3bd   :  { %v1541_v23 = vmax.f32 %v1539_v18, %v1540_v35  ;;  %v1567_v25 = vmax.f32 %v1565_v3, %v1566_v53  ;;  %v1635_v26 = vmax.f32 %v1154_v4, %v1158_v60  ;;  %v1661_v27 = vmax.f32 %v1267_v6, %v1271_v1 }
 0x3be   :  { %v1554_v28 = vmax.f32 %v1552_v10, %v1553_v22  ;;  %v1580_v29 = vmax.f32 %v1578_v12, %v1579_v24  ;;  %v1648_v30 = vmax.f32 %v1156_v13, %v1160_v17  ;;  %v1674_v31 = vmax.f32 %v1269_v14, %v1273_v20 }
 0x3bf   :  { %v1542_v33 = vrot.slane %v1541_v23, 1  ;;  %v1568_v34 = vrot.slane %v1567_v25, 1 }
 0x3c0   :  { %v1555_v36 = vrot.slane %v1554_v28, 1  ;;  %v1581_v38 = vrot.slane %v1580_v29, 1  ;;  %v1163_v39 = vpop.f32.mrb[36].mxu1  ;;  %v1276_v40 = vpop.f32.mrb[52].mxu0 }
 0x3c1   :  { %v1543_v41 = vmax.f32 %v1541_v23, %v1542_v33  ;;  %v1569_v42 = vmax.f32 %v1567_v25, %v1568_v34  ;;  %v1164_v44 = vadd.f32 %v1163_v39, %v2661_v8  ;;  %v1277_v46 = vadd.f32 %v1276_v40, %v2664_v63  ;;  %v1165_v47 = vpop.f32.mrb[37].mxu1  ;;  %v1278_v48 = vpop.f32.mrb[53].mxu0 }
 0x3c2   :  { %v1556_v49 = vmax.f32 %v1554_v28, %v1555_v36  ;;  %v1582_v50 = vmax.f32 %v1580_v29, %v1581_v38  ;;  %v1166_v51 = vadd.f32 %v1165_v47, %v2667_v11  ;;  %v1279_v52 = vadd.f32 %v1278_v48, %v2670_v19  ;;  %v1167_v54 = vpop.f32.mrb[38].mxu1  ;;  %v1280_v55 = vpop.f32.mrb[54].mxu0 }
 0x3c3   :  { %v1636_v56 = vmax.f32 %v1635_v26, %v1164_v44  ;;  %v1662_v57 = vmax.f32 %v1661_v27, %v1277_v46  ;;  %v1168_v58 = vadd.f32 %v1167_v54, %v2661_v8  ;;  %v1281_v59 = vadd.f32 %v1280_v55, %v2664_v63  ;;  %v1169_v61 = vpop.f32.mrb[39].mxu1  ;;  %v1282_v62 = vpop.f32.mrb[55].mxu0 }
 0x3c4   :  { %v1759_v0 = vcombine.low %v1543_v41, %v1556_v49  ;;  %v1760_v43 = vcombine.low %v1569_v42, %v1582_v50  ;;  %v1649_v2 = vmax.f32 %v1648_v30, %v1166_v51  ;;  %v1675_v18 = vmax.f32 %v1674_v31, %v1279_v52 }
 0x3c5   :  { %v1637_v3 = vmax.f32 %v1636_v56, %v1168_v58  ;;  %v1663_v4 = vmax.f32 %v1662_v57, %v1281_v59  ;;  %v1170_v6 = vadd.f32 %v1169_v61, %v2667_v11  ;;  %v1283_v7 = vadd.f32 %v1282_v62, %v2670_v19 }
 0x3c6   :  { %v2724_v9 = vrot.slane %v1759_v0, %v2713_v37  ;;  %v2727_v10 = vrot.slane %v1760_v43, %v2713_v37  ;;  %v737_v47 = vsub.s32 4, %v2649_v16  ;;  %v745_v48 = vsub.s32 6, %v2649_v16 }
 0x3c7   :  { %v1650_v12 = vmax.f32 %v1649_v2, %v1170_v6  ;;  %v1676_v13 = vmax.f32 %v1675_v18, %v1283_v7  ;;  %v741_v54 = vsub.s32 5, %v2649_v16  ;;  %v749_v55 = vsub.s32 7, %v2649_v16 }
 0x3c8   :  { %v1775_v14 = vcombine.low %v2724_v9, %v2727_v10  ;;  %v1173_v15 = vpop.f32.mrb[40].mxu1  ;;  %v1286_v32 = vpop.f32.mrb[56].mxu0  ;;  %v2752_v6 = vrot.slane %v2656_v45, %v737_v47  ;;  %v2755_v16 = vrot.slane %v2656_v45, %v745_v48 }
 0x3c9   :  { %v1174_v35 = vadd.f32 %v1173_v15, %v2661_v8  ;;  %v1287_v53 = vadd.f32 %v1286_v32, %v2664_v63  ;;  %v1175_v60 = vpop.f32.mrb[41].mxu1  ;;  %v1288_v1 = vpop.f32.mrb[57].mxu0 }
 0x3ca   :  { %v1176_v5 = vadd.f32 %v1175_v60, %v2667_v11  ;;  %v1289_v21 = vadd.f32 %v1288_v1, %v2670_v19  ;;  %v1177_v22 = vpop.f32.mrb[42].mxu1  ;;  %v1290_v24 = vpop.f32.mrb[58].mxu0 }
 0x3cb   :  { %v1638_v17 = vmax.f32 %v1637_v3, %v1174_v35  ;;  %v1664_v20 = vmax.f32 %v1663_v4, %v1287_v53  ;;  %v1178_v23 = vadd.f32 %v1177_v22, %v2661_v8  ;;  %v1291_v25 = vadd.f32 %v1290_v24, %v2664_v63  ;;  %v1179_v26 = vpop.f32.mrb[43].mxu1  ;;  %v1292_v27 = vpop.f32.mrb[59].mxu0 }
 0x3cc   :  { %v1651_v28 = vmax.f32 %v1650_v12, %v1176_v5  ;;  %v1677_v29 = vmax.f32 %v1676_v13, %v1289_v21  ;;  %v1180_v30 = vadd.f32 %v1179_v26, %v2667_v11  ;;  %v1293_v31 = vadd.f32 %v1292_v27, %v2670_v19 }
 0x3cd   :  { %v1639_v33 = vmax.f32 %v1638_v17, %v1178_v23  ;;  %v1665_v34 = vmax.f32 %v1664_v20, %v1291_v25  ;;  %v2761_v12 = vrot.slane %v2656_v45, %v749_v55 }
 0x3ce   :  { %v1652_v36 = vmax.f32 %v1651_v28, %v1180_v30  ;;  %v1678_v38 = vmax.f32 %v1677_v29, %v1293_v31 }
 0x3d0   :  { %v1183_v39 = vpop.f32.mrb[44].mxu1  ;;  %v1296_v40 = vpop.f32.mrb[60].mxu0 }
 0x3d1   :  { %v1184_v41 = vadd.f32 %v1183_v39, %v2661_v8  ;;  %v1297_v42 = vadd.f32 %v1296_v40, %v2664_v63  ;;  %v1185_v44 = vpop.f32.mrb[45].mxu1  ;;  %v1298_v46 = vpop.f32.mrb[61].mxu0 }
 0x3d2   :  { %v1186_v49 = vadd.f32 %v1185_v44, %v2667_v11  ;;  %v1299_v50 = vadd.f32 %v1298_v46, %v2670_v19  ;;  %v1187_v51 = vpop.f32.mrb[46].mxu1  ;;  %v1300_v52 = vpop.f32.mrb[62].mxu0 }
 0x3d3   :  { %v1640_v56 = vmax.f32 %v1639_v33, %v1184_v41  ;;  %v1666_v57 = vmax.f32 %v1665_v34, %v1297_v42  ;;  %v1188_v58 = vadd.f32 %v1187_v51, %v2661_v8  ;;  %v1301_v59 = vadd.f32 %v1300_v52, %v2664_v63  ;;  %v1189_v61 = vpop.f32.mrb[47].mxu1  ;;  %v1302_v62 = vpop.f32.mrb[63].mxu0 }
 0x3d4   :  { %v1653_v0 = vmax.f32 %v1652_v36, %v1186_v49  ;;  %v1679_v43 = vmax.f32 %v1678_v38, %v1299_v50  ;;  %v1190_v2 = vadd.f32 %v1189_v61, %v2667_v11  ;;  %v1303_v18 = vadd.f32 %v1302_v62, %v2670_v19 }
 0x3d5   :  { %v1641_v3 = vmax.f32 %v1640_v56, %v1188_v58  ;;  %v1667_v4 = vmax.f32 %v1666_v57, %v1301_v59  ;;  %v2758_v63 = vrot.slane %v2656_v45, %v741_v54 }
 0x3d6   :  { %v1654_v7 = vmax.f32 %v1653_v0, %v1190_v2  ;;  %v1680_v8 = vmax.f32 %v1679_v43, %v1303_v18 }
 0x3d7   :  { %v1642_v13 = vrot.slane %v1641_v3, 4  ;;  %v1668_v11 = vrot.slane %v1667_v4, 4 }
 0x3d8   :  { %v1655_v15 = vrot.slane %v1654_v7, 4  ;;  %v1681_v19 = vrot.slane %v1680_v8, 4  ;;  %v1339_v32 = vpop.f32.mrb[48].mxu1  ;;  %v1452_v35 = vpop.f32.mrb[64].mxu0 }
 0x3d9   :  { %v1643_v53 = vmax.f32 %v1641_v3, %v1642_v13  ;;  %v1669_v60 = vmax.f32 %v1667_v4, %v1668_v11  ;;  %v1340_v1 = vadd.f32 %v1339_v32, %v2752_v6  ;;  %v1453_v5 = vadd.f32 %v1452_v35, %v2755_v16  ;;  %v1341_v21 = vpop.f32.mrb[49].mxu1  ;;  %v1454_v22 = vpop.f32.mrb[65].mxu0 }
 0x3da   :  { %v1656_v24 = vmax.f32 %v1654_v7, %v1655_v15  ;;  %v1682_v17 = vmax.f32 %v1680_v8, %v1681_v19  ;;  %v1342_v20 = vadd.f32 %v1341_v21, %v2758_v63  ;;  %v1455_v45 = vadd.f32 %v1454_v22, %v2761_v12  ;;  %v1343_v23 = vpop.f32.mrb[50].mxu1  ;;  %v1456_v25 = vpop.f32.mrb[66].mxu0 }
 0x3db   :  { %v1644_v26 = vrot.slane %v1643_v53, 2  ;;  %v1670_v27 = vrot.slane %v1669_v60, 2  ;;  %v1344_v28 = vadd.f32 %v1343_v23, %v2752_v6  ;;  %v1457_v29 = vadd.f32 %v1456_v25, %v2755_v16  ;;  %v1345_v30 = vpop.f32.mrb[51].mxu1  ;;  %v1458_v31 = vpop.f32.mrb[67].mxu0 }
 0x3dc   :  { %v1657_v33 = vrot.slane %v1656_v24, 2  ;;  %v1683_v34 = vrot.slane %v1682_v17, 2  ;;  %v1346_v36 = vadd.f32 %v1345_v30, %v2758_v63  ;;  %v1459_v38 = vadd.f32 %v1458_v31, %v2761_v12 }
 0x3dd   :  { %v1645_v39 = vmax.f32 %v1643_v53, %v1644_v26  ;;  %v1671_v40 = vmax.f32 %v1669_v60, %v1670_v27  ;;  %v1583_v41 = vmax.f32 %v1340_v1, %v1344_v28  ;;  %v1609_v42 = vmax.f32 %v1453_v5, %v1457_v29 }
 0x3de   :  { %v1658_v44 = vmax.f32 %v1656_v24, %v1657_v33  ;;  %v1684_v46 = vmax.f32 %v1682_v17, %v1683_v34  ;;  %v1596_v47 = vmax.f32 %v1342_v20, %v1346_v36  ;;  %v1622_v48 = vmax.f32 %v1455_v45, %v1459_v38 }
 0x3df   :  { %v1646_v49 = vrot.slane %v1645_v39, 1  ;;  %v1672_v50 = vrot.slane %v1671_v40, 1 }
 0x3e0   :  { %v1659_v51 = vrot.slane %v1658_v44, 1  ;;  %v1685_v52 = vrot.slane %v1684_v46, 1  ;;  %v1349_v54 = vpop.f32.mrb[52].mxu1  ;;  %v1462_v55 = vpop.f32.mrb[68].mxu0 }
 0x3e1   :  { %v1647_v56 = vmax.f32 %v1645_v39, %v1646_v49  ;;  %v1673_v57 = vmax.f32 %v1671_v40, %v1672_v50  ;;  %v1350_v58 = vadd.f32 %v1349_v54, %v2752_v6  ;;  %v1463_v59 = vadd.f32 %v1462_v55, %v2755_v16  ;;  %v1351_v61 = vpop.f32.mrb[53].mxu1  ;;  %v1464_v62 = vpop.f32.mrb[69].mxu0 }
 0x3e2   :  { %v1660_v0 = vmax.f32 %v1658_v44, %v1659_v51  ;;  %v1686_v43 = vmax.f32 %v1684_v46, %v1685_v52  ;;  %v1352_v2 = vadd.f32 %v1351_v61, %v2758_v63  ;;  %v1465_v18 = vadd.f32 %v1464_v62, %v2761_v12  ;;  %v1353_v3 = vpop.f32.mrb[54].mxu1  ;;  %v1466_v4 = vpop.f32.mrb[70].mxu0 }
 0x3e3   :  { %v1584_v7 = vmax.f32 %v1583_v41, %v1350_v58  ;;  %v1610_v8 = vmax.f32 %v1609_v42, %v1463_v59  ;;  %v1354_v13 = vadd.f32 %v1353_v3, %v2752_v6  ;;  %v1467_v11 = vadd.f32 %v1466_v4, %v2755_v16  ;;  %v1355_v15 = vpop.f32.mrb[55].mxu1  ;;  %v1468_v19 = vpop.f32.mrb[71].mxu0 }
 0x3e4   :  { %v1793_v32 = vcombine.low %v1647_v56, %v1660_v0  ;;  %v1794_v35 = vcombine.low %v1673_v57, %v1686_v43  ;;  %v1597_v53 = vmax.f32 %v1596_v47, %v1352_v2  ;;  %v1623_v60 = vmax.f32 %v1622_v48, %v1465_v18 }
 0x3e5   :  { %v1585_v1 = vmax.f32 %v1584_v7, %v1354_v13  ;;  %v1611_v5 = vmax.f32 %v1610_v8, %v1467_v11  ;;  %v1356_v21 = vadd.f32 %v1355_v15, %v2758_v63  ;;  %v1469_v22 = vadd.f32 %v1468_v19, %v2761_v12 }
 0x3e6   :  { %v1801_v24 = vrot.slane %v1793_v32, %v2713_v37  ;;  %v1808_v17 = vrot.slane %v1794_v35, %v2713_v37 }
 0x3e7   :  { %v1598_v20 = vmax.f32 %v1597_v53, %v1356_v21  ;;  %v1624_v45 = vmax.f32 %v1623_v60, %v1469_v22 }
 0x3e8   :  { %v1359_v23 = vpop.f32.mrb[56].mxu1  ;;  %v1472_v25 = vpop.f32.mrb[72].mxu0  ;;  %v1809_v26 = vcombine.low %v1801_v24, %v1808_v17 }
 0x3e9   :  { %v1360_v27 = vadd.f32 %v1359_v23, %v2752_v6  ;;  %v1473_v28 = vadd.f32 %v1472_v25, %v2755_v16  ;;  %v1361_v29 = vpop.f32.mrb[57].mxu1  ;;  %v1474_v30 = vpop.f32.mrb[73].mxu0 }
 0x3ea   :  { %v1362_v31 = vadd.f32 %v1361_v29, %v2758_v63  ;;  %v1475_v33 = vadd.f32 %v1474_v30, %v2761_v12  ;;  %v1363_v34 = vpop.f32.mrb[58].mxu1  ;;  %v1476_v36 = vpop.f32.mrb[74].mxu0  ;;  %v1831_v38 = vrot.slane %v1809_v26, 7 }
 0x3eb   :  { %v1586_v39 = vmax.f32 %v1585_v1, %v1360_v27  ;;  %v1612_v40 = vmax.f32 %v1611_v5, %v1473_v28  ;;  %v1364_v41 = vadd.f32 %v1363_v34, %v2752_v6  ;;  %v1477_v42 = vadd.f32 %v1476_v36, %v2755_v16  ;;  %v1365_v44 = vpop.f32.mrb[59].mxu1  ;;  %v1478_v46 = vpop.f32.mrb[75].mxu0 }
 0x3ec   :  { %v1599_v47 = vmax.f32 %v1598_v20, %v1362_v31  ;;  %v1625_v48 = vmax.f32 %v1624_v45, %v1475_v33  ;;  %v1366_v49 = vadd.f32 %v1365_v44, %v2758_v63  ;;  %v1479_v50 = vadd.f32 %v1478_v46, %v2761_v12 }
 0x3ed   :  { %v1587_v51 = vmax.f32 %v1586_v39, %v1364_v41  ;;  %v1613_v52 = vmax.f32 %v1612_v40, %v1477_v42  ;;  %v1833_v54 = vsel %vm1832_vm3, %v1831_v38, %v1775_v14 }
 0x3ee   :  { %v1600_v55 = vmax.f32 %v1599_v47, %v1366_v49  ;;  %v1626_v56 = vmax.f32 %v1625_v48, %v1479_v50  ;;  %v1835_v57 = vsel %vm1834_vm4, %v1831_v38, %v1833_v54 }
 0x3ef   :  { %v1837_v58 = vsel %vm1836_vm5, %v1831_v38, %v1835_v57 }
 0x3f0   :  { %v1369_v59 = vpop.f32.mrb[60].mxu1  ;;  %v1482_v61 = vpop.f32.mrb[76].mxu0  ;;  %v1839_v62 = vsel %vm1838_vm6, %v1831_v38, %v1837_v58 }
 0x3f1   :  { %v1370_v0 = vadd.f32 %v1369_v59, %v2752_v6  ;;  %v1483_v43 = vadd.f32 %v1482_v61, %v2755_v16  ;;  %v1371_v2 = vpop.f32.mrb[61].mxu1  ;;  %v1484_v18 = vpop.f32.mrb[77].mxu0  ;;  %1849 = vst [vmem:[#allocation7] sm:$0xff] %v1839_v62 }
 0x3f2   :  { %v1372_v9 = vadd.f32 %v1371_v2, %v2758_v63  ;;  %v1485_v10 = vadd.f32 %v1484_v18, %v2761_v12  ;;  %v1373_v14 = vpop.f32.mrb[62].mxu1  ;;  %v1486_v3 = vpop.f32.mrb[78].mxu0 }
 0x3f3   :  { %v1588_v4 = vmax.f32 %v1587_v51, %v1370_v0  ;;  %v1614_v7 = vmax.f32 %v1613_v52, %v1483_v43  ;;  %v1374_v8 = vadd.f32 %v1373_v14, %v2752_v6  ;;  %v1487_v13 = vadd.f32 %v1486_v3, %v2755_v16  ;;  %v1375_v11 = vpop.f32.mrb[63].mxu1  ;;  %v1488_v15 = vpop.f32.mrb[79].mxu0 }
 0x3f4   :  { %v1601_v19 = vmax.f32 %v1600_v55, %v1372_v9  ;;  %v1627_v32 = vmax.f32 %v1626_v56, %v1485_v10  ;;  %v1376_v35 = vadd.f32 %v1375_v11, %v2758_v63  ;;  %v1489_v53 = vadd.f32 %v1488_v15, %v2761_v12 }
 0x3f5   :  { %v1589_v60 = vmax.f32 %v1588_v4, %v1374_v8  ;;  %v1615_v1 = vmax.f32 %v1614_v7, %v1487_v13 }
 0x3f6   :  { %v1602_v5 = vmax.f32 %v1601_v19, %v1376_v35  ;;  %v1628_v21 = vmax.f32 %v1627_v32, %v1489_v53 }
 0x3f7   :  { %v1590_v22 = vrot.slane %v1589_v60, 4  ;;  %v1616_v24 = vrot.slane %v1615_v1, 4 }
 0x3f8   :  { %v1603_v17 = vrot.slane %v1602_v5, 4  ;;  %v1629_v20 = vrot.slane %v1628_v21, 4  ;;  %v1379_v45 = vpop.f32.mrb[64].mxu1  ;;  %v1492_v23 = vpop.f32.mrb[80].mxu0 }
 0x3f9   :  { %v1591_v25 = vmax.f32 %v1589_v60, %v1590_v22  ;;  %v1617_v26 = vmax.f32 %v1615_v1, %v1616_v24  ;;  %v1380_v27 = vadd.f32 %v1379_v45, %v2752_v6  ;;  %v1493_v28 = vadd.f32 %v1492_v23, %v2755_v16  ;;  %v1381_v29 = vpop.f32.mrb[65].mxu1  ;;  %v1494_v30 = vpop.f32.mrb[81].mxu0 }
 0x3fa   :  { %v1604_v31 = vmax.f32 %v1602_v5, %v1603_v17  ;;  %v1630_v33 = vmax.f32 %v1628_v21, %v1629_v20  ;;  %v1382_v34 = vadd.f32 %v1381_v29, %v2758_v63  ;;  %v1495_v36 = vadd.f32 %v1494_v30, %v2761_v12  ;;  %v1383_v38 = vpop.f32.mrb[66].mxu1  ;;  %v1496_v39 = vpop.f32.mrb[82].mxu0 }
 0x3fb   :  { %v1592_v40 = vrot.slane %v1591_v25, 2  ;;  %v1618_v41 = vrot.slane %v1617_v26, 2  ;;  %v1384_v42 = vadd.f32 %v1383_v38, %v2752_v6  ;;  %v1497_v44 = vadd.f32 %v1496_v39, %v2755_v16  ;;  %v1385_v46 = vpop.f32.mrb[67].mxu1  ;;  %v1498_v47 = vpop.f32.mrb[83].mxu0 }
 0x3fc   :  { %v1605_v48 = vrot.slane %v1604_v31, 2  ;;  %v1631_v49 = vrot.slane %v1630_v33, 2  ;;  %v1386_v50 = vadd.f32 %v1385_v46, %v2758_v63  ;;  %v1499_v51 = vadd.f32 %v1498_v47, %v2761_v12 }
 0x3fd   :  { %v1593_v52 = vmax.f32 %v1591_v25, %v1592_v40  ;;  %v1619_v54 = vmax.f32 %v1617_v26, %v1618_v41  ;;  %v1687_v55 = vmax.f32 %v1380_v27, %v1384_v42  ;;  %v1713_v56 = vmax.f32 %v1493_v28, %v1497_v44 }
 0x3fe   :  { %v1606_v57 = vmax.f32 %v1604_v31, %v1605_v48  ;;  %v1632_v58 = vmax.f32 %v1630_v33, %v1631_v49  ;;  %v1700_v59 = vmax.f32 %v1382_v34, %v1386_v50  ;;  %v1726_v61 = vmax.f32 %v1495_v36, %v1499_v51 }
 0x3ff   :  { %v1594_v62 = vrot.slane %v1593_v52, 1  ;;  %v1620_v0 = vrot.slane %v1619_v54, 1 }
 0x400   :  { %v1607_v43 = vrot.slane %v1606_v57, 1  ;;  %v1633_v2 = vrot.slane %v1632_v58, 1  ;;  %v1389_v18 = vpop.f32.mrb[68].mxu1  ;;  %v1502_v9 = vpop.f32.mrb[84].mxu0 }
 0x401   :  { %v1595_v10 = vmax.f32 %v1593_v52, %v1594_v62  ;;  %v1621_v14 = vmax.f32 %v1619_v54, %v1620_v0  ;;  %v1390_v3 = vadd.f32 %v1389_v18, %v2752_v6  ;;  %v1503_v4 = vadd.f32 %v1502_v9, %v2755_v16  ;;  %v1391_v7 = vpop.f32.mrb[69].mxu1  ;;  %v1504_v8 = vpop.f32.mrb[85].mxu0 }
 0x402   :  { %v1608_v13 = vmax.f32 %v1606_v57, %v1607_v43  ;;  %v1634_v11 = vmax.f32 %v1632_v58, %v1633_v2  ;;  %v1392_v15 = vadd.f32 %v1391_v7, %v2758_v63  ;;  %v1505_v19 = vadd.f32 %v1504_v8, %v2761_v12  ;;  %v1393_v32 = vpop.f32.mrb[70].mxu1  ;;  %v1506_v35 = vpop.f32.mrb[86].mxu0 }
 0x403   :  { %v1688_v53 = vmax.f32 %v1687_v55, %v1390_v3  ;;  %v1714_v60 = vmax.f32 %v1713_v56, %v1503_v4  ;;  %v1394_v1 = vadd.f32 %v1393_v32, %v2752_v6  ;;  %v1507_v5 = vadd.f32 %v1506_v35, %v2755_v16  ;;  %v1395_v21 = vpop.f32.mrb[71].mxu1  ;;  %v1508_v22 = vpop.f32.mrb[87].mxu0 }
 0x404   :  { %v1776_v24 = vcombine.low %v1595_v10, %v1608_v13  ;;  %v1777_v17 = vcombine.low %v1621_v14, %v1634_v11  ;;  %v1701_v20 = vmax.f32 %v1700_v59, %v1392_v15  ;;  %v1727_v45 = vmax.f32 %v1726_v61, %v1505_v19 }
 0x405   :  { %v1689_v23 = vmax.f32 %v1688_v53, %v1394_v1  ;;  %v1715_v25 = vmax.f32 %v1714_v60, %v1507_v5  ;;  %v1396_v26 = vadd.f32 %v1395_v21, %v2758_v63  ;;  %v1509_v27 = vadd.f32 %v1508_v22, %v2761_v12 }
 0x406   :  { %v2821_v28 = vrot.slane %v1776_v24, %v2713_v37  ;;  %v2824_v29 = vrot.slane %v1777_v17, %v2713_v37 }
 0x407   :  { %v1702_v30 = vmax.f32 %v1701_v20, %v1396_v26  ;;  %v1728_v31 = vmax.f32 %v1727_v45, %v1509_v27 }
 0x408   :  { %v1792_v33 = vcombine.low %v2821_v28, %v2824_v29  ;;  %v1399_v34 = vpop.f32.mrb[72].mxu1  ;;  %v1512_v36 = vpop.f32.mrb[88].mxu0 }
 0x409   :  { %v1400_v38 = vadd.f32 %v1399_v34, %v2752_v6  ;;  %v1513_v39 = vadd.f32 %v1512_v36, %v2755_v16  ;;  %v1401_v40 = vpop.f32.mrb[73].mxu1  ;;  %v1514_v41 = vpop.f32.mrb[89].mxu0 }
 0x40a   :  { %v1402_v42 = vadd.f32 %v1401_v40, %v2758_v63  ;;  %v1515_v44 = vadd.f32 %v1514_v41, %v2761_v12  ;;  %v1403_v46 = vpop.f32.mrb[74].mxu1  ;;  %v1516_v47 = vpop.f32.mrb[90].mxu0 }
 0x40b   :  { %v1690_v48 = vmax.f32 %v1689_v23, %v1400_v38  ;;  %v1716_v49 = vmax.f32 %v1715_v25, %v1513_v39  ;;  %v1404_v50 = vadd.f32 %v1403_v46, %v2752_v6  ;;  %v1517_v51 = vadd.f32 %v1516_v47, %v2755_v16  ;;  %v1405_v52 = vpop.f32.mrb[75].mxu1  ;;  %v1518_v54 = vpop.f32.mrb[91].mxu0 }
 0x40c   :  { %v1703_v55 = vmax.f32 %v1702_v30, %v1402_v42  ;;  %v1729_v56 = vmax.f32 %v1728_v31, %v1515_v44  ;;  %v1406_v57 = vadd.f32 %v1405_v52, %v2758_v63  ;;  %v1519_v58 = vadd.f32 %v1518_v54, %v2761_v12 }
 0x40d   :  { %v1691_v59 = vmax.f32 %v1690_v48, %v1404_v50  ;;  %v1717_v61 = vmax.f32 %v1716_v49, %v1517_v51 }
 0x40e   :  { %v1704_v62 = vmax.f32 %v1703_v55, %v1406_v57  ;;  %v1730_v0 = vmax.f32 %v1729_v56, %v1519_v58 }
 0x410   :  { %v1409_v43 = vpop.f32.mrb[76].mxu1 }
 0x411   :  { %v1410_v2 = vadd.f32 %v1409_v43, %v2752_v6  ;;  %v1411_v18 = vpop.f32.mrb[77].mxu1 }
 0x412   :  { %v1412_v9 = vadd.f32 %v1411_v18, %v2758_v63  ;;  %v1413_v10 = vpop.f32.mrb[78].mxu1 }
 0x413   :  { %v1692_v14 = vmax.f32 %v1691_v59, %v1410_v2  ;;  %v1414_v3 = vadd.f32 %v1413_v10, %v2752_v6  ;;  %v1415_v4 = vpop.f32.mrb[79].mxu1 }
 0x414   :  { %v1705_v7 = vmax.f32 %v1704_v62, %v1412_v9  ;;  %v1416_v8 = vadd.f32 %v1415_v4, %v2758_v63 }
 0x415   :  { %v1693_v13 = vmax.f32 %v1692_v14, %v1414_v3 }
 0x416   :  { %v1706_v11 = vmax.f32 %v1705_v7, %v1416_v8 }
 0x417   :  { %v1694_v15 = vrot.slane %v1693_v13, 4 }
 0x418   :  { %v1707_v19 = vrot.slane %v1706_v11, 4  ;;  %v1522_v32 = vpop.f32.mrb[80].mxu1 }
 0x419   :  { %v1695_v35 = vmax.f32 %v1693_v13, %v1694_v15  ;;  %v1523_v53 = vadd.f32 %v1522_v32, %v2755_v16  ;;  %v1524_v60 = vpop.f32.mrb[81].mxu1 }
 0x41a   :  { %v1708_v1 = vmax.f32 %v1706_v11, %v1707_v19  ;;  %v1525_v5 = vadd.f32 %v1524_v60, %v2761_v12  ;;  %v1526_v21 = vpop.f32.mrb[82].mxu1 }
 0x41b   :  { %v1696_v22 = vrot.slane %v1695_v35, 2  ;;  %v1718_v24 = vmax.f32 %v1717_v61, %v1523_v53  ;;  %v1527_v6 = vadd.f32 %v1526_v21, %v2755_v16  ;;  %v1528_v17 = vpop.f32.mrb[83].mxu1 }
 0x41c   :  { %v1709_v20 = vrot.slane %v1708_v1, 2  ;;  %v1731_v63 = vmax.f32 %v1730_v0, %v1525_v5  ;;  %v1529_v45 = vadd.f32 %v1528_v17, %v2761_v12 }
 0x41d   :  { %v1697_v23 = vmax.f32 %v1695_v35, %v1696_v22  ;;  %v1719_v25 = vmax.f32 %v1718_v24, %v1527_v6 }
 0x41e   :  { %v1710_v26 = vmax.f32 %v1708_v1, %v1709_v20  ;;  %v1732_v27 = vmax.f32 %v1731_v63, %v1529_v45 }
 0x41f   :  { %v1698_v30 = vrot.slane %v1697_v23, 1  ;;  %v1720_v31 = vrot.slane %v1719_v25, 4 }
 0x420   :  { %v1711_v34 = vrot.slane %v1710_v26, 1  ;;  %v1733_v36 = vrot.slane %v1732_v27, 4 }
 0x421   :  { %v1699_v38 = vmax.f32 %v1697_v23, %v1698_v30  ;;  %v1721_v39 = vmax.f32 %v1719_v25, %v1720_v31 }
 0x422   :  { %v1712_v40 = vmax.f32 %v1710_v26, %v1711_v34  ;;  %v1734_v41 = vmax.f32 %v1732_v27, %v1733_v36 }
 0x423   :  { %v1722_v42 = vrot.slane %v1721_v39, 2 }
 0x424   :  { %v1810_v44 = vcombine.low %v1699_v38, %v1712_v40  ;;  %v1735_v16 = vrot.slane %v1734_v41, 2 }
 0x425   :  { %v1723_v46 = vmax.f32 %v1721_v39, %v1722_v42 }
 0x426   :  { %v1736_v47 = vmax.f32 %v1734_v41, %v1735_v16  ;;  %v1818_v52 = vrot.slane %v1810_v44, %v2713_v37 }
 0x427   :  { %v1724_v48 = vrot.slane %v1723_v46, 1 }
 0x428   :  { %v1737_v49 = vrot.slane %v1736_v47, 1 }
 0x429   :  { %v1725_v12 = vmax.f32 %v1723_v46, %v1724_v48 }
 0x42a   :  { %v1738_v50 = vmax.f32 %v1736_v47, %v1737_v49 }
 0x42c   :  { %v1811_v51 = vcombine.low %v1725_v12, %v1738_v50 }
 0x42e   :  { %v1825_v54 = vrot.slane %v1811_v51, %v2713_v37 }
 0x430   :  { %v1826_v55 = vcombine.low %v1818_v52, %v1825_v54 }
 0x432   :  { %v1842_v56 = vrot.slane %v1826_v55, 7 }
 0x434   :  { %v1843_v57 = vsel %vm1832_vm3, %v1842_v56, %v1792_v33 }
 0x435   :  { %v1844_v58 = vsel %vm1834_vm4, %v1842_v56, %v1843_v57 }
 0x436   :  { %v1845_v59 = vsel %vm1836_vm5, %v1842_v56, %v1844_v58 }
 0x437   :  { %v1846_v61 = vsel %vm1838_vm6, %v1842_v56, %v1845_v59 }
 0x438   :  { %1850 = vst [vmem:[#allocation7 + $0x8] sm:$0xff] %v1846_v61 }
 0x439   :  { %2298 = shalt.err (!%p2295_p6)
}
 0x43a   :  { %s2299_s30 = scalar_lea.hbm %s2874_s9, 256 }
 0x43b   :  { %p2300_p7 = scmp.ne.s32.totalorder %s2874_s9, %s2299_s30  ;;  %p2303_p8 = scmp.lt.u32.totalorder %s2299_s30, %s2874_s9 }
 0x43d   :  { %p2305_p9 = pnand %p2303_p8, %p2300_p7 }
 0x43f   :  { %2308 = shalt.err (!%p2305_p9)
}
 0x440   :  { %1976 = dma.vmem_to_hbm [thread:$0]  %s1974_s26, 256, %s2874_s9, [#allocation4]  }
 0x441   :  { %2313 = dma.done.wait [#allocation4], 256  }
 0x442   :  { %2314 = vsyncadd [#allocation4], 4294967040 }
 0x443   :  { %1980 = vsyncpa [#allocation3], 1 }
 0x444   :  { %1981 = vsyncpa [#allocation6], 1 }
 0x445   :  { %1982 = vsyncpa [#allocation4], 1 }

</bundles_post_ra>
